<compile_context>
chip_gen: v7x
topology: tpu7x:2x2x1
jax: 0.10.0
libtpu: 0.0.40
codegen_flags: <defaults>
</compile_context>

<pallas_src>
import jax
import jax.numpy as jnp
from jax.experimental import pallas as pl
from jax.experimental.pallas import tpu as pltpu


H = 28
W = 28
HW = H * W            # 784 lanes -> lane-dense activations
C_OUT = 4
TAPS = 9              # 3x3 receptive field, Cin = 1
N_FC1 = 20
N_FC2 = 10
BATCH_TILE = 8        # samples per grid step (clipped to B for small batches)


# -----------------------------------------------------------------------------
# Fused kernel: conv1 + bias + ReLU + fc1 + fc2 for one batch tile.
# -----------------------------------------------------------------------------
def fused_forward_kernel(patch_ref, wc_ref, bc_ref, w1_ref, b1_ref,
                         w2_ref, b2_ref, o_ref):
    # patch_ref: (TAPS, BT, HW)      im2col taps, lane-dense over H*W
    # wc_ref:    (C_OUT*TAPS,) SMEM  conv weights, index = co*9 + kh*3 + kw
    # bc_ref:    (C_OUT,)      SMEM  conv bias
    # w1_ref:    (C_OUT*HW, N_FC1)   fc1 weight (torch.flatten(NCHW) row order)
    # b1_ref:    (1, N_FC1)
    # w2_ref:    (N_FC1, N_FC2)
    # b2_ref:    (1, N_FC2)
    # o_ref:     (BT, N_FC2)
    bt = o_ref.shape[0]
    acc = jnp.zeros((bt, N_FC1), jnp.float32)
    for co in range(C_OUT):
        # conv channel co, lane-dense (BT, 784): 9 scalar*vector MACs on the VPU
        a = jnp.zeros((bt, HW), jnp.float32)
        for t in range(TAPS):
            a = a + wc_ref[co * TAPS + t] * patch_ref[t]
        a = jnp.maximum(a + bc_ref[co], 0.0)                       # bias + ReLU
        # fc1 partial contraction for this channel's 784 features (MXU, f32 acc)
        acc = acc + jnp.dot(a, w1_ref[co * HW:(co + 1) * HW, :],
                            preferred_element_type=jnp.float32)
    h = acc + b1_ref[...]                                          # fc1 bias
    y = jnp.dot(h, w2_ref[...], preferred_element_type=jnp.float32) + b2_ref[...]
    o_ref[...] = y.astype(o_ref.dtype)


# -----------------------------------------------------------------------------
# Wrapper glue (tiny XLA ops) + pallas_call.
# -----------------------------------------------------------------------------
def _im2col_3x3(x_nchw):
    """(B, 1, 28, 28) -> (9, B, 784) shifted taps with zero padding,
    tap order t = kh*3 + kw (matches conv-weight flattening)."""
    b = x_nchw.shape[0]
    xp = jnp.pad(x_nchw[:, 0], ((0, 0), (1, 1), (1, 1)))
    taps = [xp[:, kh:kh + H, kw:kw + W].reshape(b, HW)
            for kh in range(3) for kw in range(3)]
    return jnp.stack(taps, axis=0)


def mymodel3_forward(x_nchw, p):
    B = x_nchw.shape[0]
    bt = min(BATCH_TILE, B)

    patches = _im2col_3x3(x_nchw).astype(jnp.float32)        # (9, B, 784)
    wc = p["w_conv1"].reshape(-1).astype(jnp.float32)        # (36,)  co*9+kh*3+kw
    bc = p["b_conv1"].astype(jnp.float32)                    # (4,)
    w1 = p["w_fc1"]                                          # (3136, 20)
    b1 = p["b_fc1"].reshape(1, N_FC1)
    w2 = p["w_fc2"]                                          # (20, 10)
    b2 = p["b_fc2"].reshape(1, N_FC2)

    smem = pltpu.MemorySpace.SMEM
    return pl.pallas_call(
        fused_forward_kernel,
        out_shape=jax.ShapeDtypeStruct((B, N_FC2), jnp.float32),
        grid=(pl.cdiv(B, bt),),
        in_specs=[
            pl.BlockSpec((TAPS, bt, HW), lambda b: (0, b, 0)),   # im2col taps
            pl.BlockSpec(memory_space=smem),                      # conv weight
            pl.BlockSpec(memory_space=smem),                      # conv bias
            pl.BlockSpec((C_OUT * HW, N_FC1), lambda b: (0, 0)),  # fc1 weight
            pl.BlockSpec((1, N_FC1), lambda b: (0, 0)),           # fc1 bias
            pl.BlockSpec((N_FC1, N_FC2), lambda b: (0, 0)),       # fc2 weight
            pl.BlockSpec((1, N_FC2), lambda b: (0, 0)),           # fc2 bias
        ],
        out_specs=pl.BlockSpec((bt, N_FC2), lambda b: (b, 0)),
        compiler_params=pltpu.CompilerParams(
            dimension_semantics=("parallel",)),
    )(patches, wc, bc, w1, b1, w2, b2)


# -----------------------------------------------------------------------------
# Params + pure-JAX reference for validation.
# -----------------------------------------------------------------------------
def init_params(key):
    ks = jax.random.split(key, 6)
    return {
        "w_conv1": 0.10 * jax.random.normal(ks[0], (C_OUT, 1, 3, 3), jnp.float32),
        "b_conv1": 0.10 * jax.random.normal(ks[1], (C_OUT,), jnp.float32),
        "w_fc1": 0.02 * jax.random.normal(ks[2], (C_OUT * HW, N_FC1), jnp.float32),
        "b_fc1": 0.10 * jax.random.normal(ks[3], (N_FC1,), jnp.float32),
        "w_fc2": 0.10 * jax.random.normal(ks[4], (N_FC1, N_FC2), jnp.float32),
        "b_fc2": 0.10 * jax.random.normal(ks[5], (N_FC2,), jnp.float32),
    }


def reference_forward(x_nchw, p):
    z = jax.lax.conv_general_dilated(
        x_nchw, p["w_conv1"], window_strides=(1, 1), padding="SAME",
        dimension_numbers=("NCHW", "OIHW", "NCHW"))
    z = jax.nn.relu(z + p["b_conv1"].reshape(1, C_OUT, 1, 1))
    flat = z.reshape(x_nchw.shape[0], -1)                 # torch.flatten(x, 1)
    h = flat @ p["w_fc1"] + p["b_fc1"]
    return h @ p["w_fc2"] + p["b_fc2"]


if __name__ == "__main__":
    key = jax.random.PRNGKey(0)
    k_x, k_p = jax.random.split(key)
    # Spatial size fixed at 28x28 by fc1 (4 * 28 * 28 input features).
    x = jax.random.normal(k_x, (2, 1, H, W), jnp.float32)
    params = init_params(k_p)

    out = jax.block_until_ready(mymodel3_forward(x, params))
    ref = jax.block_until_ready(reference_forward(x, params))

    assert out.shape == (2, N_FC2), out.shape
    assert jnp.allclose(out, ref, rtol=1e-2, atol=1e-2), (out, ref)

    print("KERNEL_OK")
</pallas_src>

<mosaic_0001>
module attributes {stable_mosaic.version = 11 : i64} {
  func.func @fused_forward_kernel(%arg0: i32, %arg1: memref<9x2x784xf32, #tpu.memory_space<vmem>>, %arg2: memref<36xf32, #tpu.memory_space<smem>>, %arg3: memref<4xf32, #tpu.memory_space<smem>>, %arg4: memref<3136x20xf32, #tpu.memory_space<vmem>>, %arg5: memref<1x20xf32, #tpu.memory_space<vmem>>, %arg6: memref<20x10xf32, #tpu.memory_space<vmem>>, %arg7: memref<1x10xf32, #tpu.memory_space<vmem>>, %arg8: memref<2x10xf32, #tpu.memory_space<vmem>>) attributes {dimension_semantics = [#tpu.dimension_semantics<parallel>], iteration_bounds = array<i64: 1>, scalar_prefetch = 0 : i64, scratch_operands = 0 : i64, tpu.core_type = #tpu.core_type<tc>, window_params = [{transform_indices = @transform_0, window_bounds = array<i64: 9, 2, 784>}, {transform_indices = @transform_1, window_bounds = array<i64: 36>}, {transform_indices = @transform_2, window_bounds = array<i64: 4>}, {pipeline_mode = #tpu.pipeline_mode<synchronous>, transform_indices = @transform_3, window_bounds = array<i64: 3136, 20>}, {pipeline_mode = #tpu.pipeline_mode<synchronous>, transform_indices = @transform_4, window_bounds = array<i64: 1, 20>}, {pipeline_mode = #tpu.pipeline_mode<synchronous>, transform_indices = @transform_5, window_bounds = array<i64: 20, 10>}, {pipeline_mode = #tpu.pipeline_mode<synchronous>, transform_indices = @transform_6, window_bounds = array<i64: 1, 10>}, {transform_indices = @transform_7, window_bounds = array<i64: 2, 10>}]} {
    %cst = arith.constant 0.000000e+00 : f32
    %0 = vector.broadcast %cst : f32 to vector<2x20xf32>
    %cst_0 = arith.constant 0.000000e+00 : f32
    %1 = vector.broadcast %cst_0 : f32 to vector<2x784xf32>
    %c0 = arith.constant 0 : index
    %2 = memref.load %arg2[%c0] : memref<36xf32, #tpu.memory_space<smem>>
    %c0_1 = arith.constant 0 : index
    %c0_2 = arith.constant 0 : index
    %c0_3 = arith.constant 0 : index
    %3 = vector.load %arg1[%c0_1, %c0_2, %c0_3] : memref<9x2x784xf32, #tpu.memory_space<vmem>>, vector<1x2x784xf32>
    %4 = vector.shape_cast %3 : vector<1x2x784xf32> to vector<2x784xf32>
    %5 = vector.broadcast %2 : f32 to vector<2x784xf32>
    %6 = arith.mulf %5, %4 : vector<2x784xf32>
    %7 = arith.addf %1, %6 : vector<2x784xf32>
    %c1 = arith.constant 1 : index
    %8 = memref.load %arg2[%c1] : memref<36xf32, #tpu.memory_space<smem>>
    %c1_4 = arith.constant 1 : index
    %c0_5 = arith.constant 0 : index
    %c0_6 = arith.constant 0 : index
    %9 = vector.load %arg1[%c1_4, %c0_5, %c0_6] : memref<9x2x784xf32, #tpu.memory_space<vmem>>, vector<1x2x784xf32>
    %10 = vector.shape_cast %9 : vector<1x2x784xf32> to vector<2x784xf32>
    %11 = vector.broadcast %8 : f32 to vector<2x784xf32>
    %12 = arith.mulf %11, %10 : vector<2x784xf32>
    %13 = arith.addf %7, %12 : vector<2x784xf32>
    %c2 = arith.constant 2 : index
    %14 = memref.load %arg2[%c2] : memref<36xf32, #tpu.memory_space<smem>>
    %c2_7 = arith.constant 2 : index
    %c0_8 = arith.constant 0 : index
    %c0_9 = arith.constant 0 : index
    %15 = vector.load %arg1[%c2_7, %c0_8, %c0_9] : memref<9x2x784xf32, #tpu.memory_space<vmem>>, vector<1x2x784xf32>
    %16 = vector.shape_cast %15 : vector<1x2x784xf32> to vector<2x784xf32>
    %17 = vector.broadcast %14 : f32 to vector<2x784xf32>
    %18 = arith.mulf %17, %16 : vector<2x784xf32>
    %19 = arith.addf %13, %18 : vector<2x784xf32>
    %c3 = arith.constant 3 : index
    %20 = memref.load %arg2[%c3] : memref<36xf32, #tpu.memory_space<smem>>
    %c3_10 = arith.constant 3 : index
    %c0_11 = arith.constant 0 : index
    %c0_12 = arith.constant 0 : index
    %21 = vector.load %arg1[%c3_10, %c0_11, %c0_12] : memref<9x2x784xf32, #tpu.memory_space<vmem>>, vector<1x2x784xf32>
    %22 = vector.shape_cast %21 : vector<1x2x784xf32> to vector<2x784xf32>
    %23 = vector.broadcast %20 : f32 to vector<2x784xf32>
    %24 = arith.mulf %23, %22 : vector<2x784xf32>
    %25 = arith.addf %19, %24 : vector<2x784xf32>
    %c4 = arith.constant 4 : index
    %26 = memref.load %arg2[%c4] : memref<36xf32, #tpu.memory_space<smem>>
    %c4_13 = arith.constant 4 : index
    %c0_14 = arith.constant 0 : index
    %c0_15 = arith.constant 0 : index
    %27 = vector.load %arg1[%c4_13, %c0_14, %c0_15] : memref<9x2x784xf32, #tpu.memory_space<vmem>>, vector<1x2x784xf32>
    %28 = vector.shape_cast %27 : vector<1x2x784xf32> to vector<2x784xf32>
    %29 = vector.broadcast %26 : f32 to vector<2x784xf32>
    %30 = arith.mulf %29, %28 : vector<2x784xf32>
    %31 = arith.addf %25, %30 : vector<2x784xf32>
    %c5 = arith.constant 5 : index
    %32 = memref.load %arg2[%c5] : memref<36xf32, #tpu.memory_space<smem>>
    %c5_16 = arith.constant 5 : index
    %c0_17 = arith.constant 0 : index
    %c0_18 = arith.constant 0 : index
    %33 = vector.load %arg1[%c5_16, %c0_17, %c0_18] : memref<9x2x784xf32, #tpu.memory_space<vmem>>, vector<1x2x784xf32>
    %34 = vector.shape_cast %33 : vector<1x2x784xf32> to vector<2x784xf32>
    %35 = vector.broadcast %32 : f32 to vector<2x784xf32>
    %36 = arith.mulf %35, %34 : vector<2x784xf32>
    %37 = arith.addf %31, %36 : vector<2x784xf32>
    %c6 = arith.constant 6 : index
    %38 = memref.load %arg2[%c6] : memref<36xf32, #tpu.memory_space<smem>>
    %c6_19 = arith.constant 6 : index
    %c0_20 = arith.constant 0 : index
    %c0_21 = arith.constant 0 : index
    %39 = vector.load %arg1[%c6_19, %c0_20, %c0_21] : memref<9x2x784xf32, #tpu.memory_space<vmem>>, vector<1x2x784xf32>
    %40 = vector.shape_cast %39 : vector<1x2x784xf32> to vector<2x784xf32>
    %41 = vector.broadcast %38 : f32 to vector<2x784xf32>
    %42 = arith.mulf %41, %40 : vector<2x784xf32>
    %43 = arith.addf %37, %42 : vector<2x784xf32>
    %c7 = arith.constant 7 : index
    %44 = memref.load %arg2[%c7] : memref<36xf32, #tpu.memory_space<smem>>
    %c7_22 = arith.constant 7 : index
    %c0_23 = arith.constant 0 : index
    %c0_24 = arith.constant 0 : index
    %45 = vector.load %arg1[%c7_22, %c0_23, %c0_24] : memref<9x2x784xf32, #tpu.memory_space<vmem>>, vector<1x2x784xf32>
    %46 = vector.shape_cast %45 : vector<1x2x784xf32> to vector<2x784xf32>
    %47 = vector.broadcast %44 : f32 to vector<2x784xf32>
    %48 = arith.mulf %47, %46 : vector<2x784xf32>
    %49 = arith.addf %43, %48 : vector<2x784xf32>
    %c8 = arith.constant 8 : index
    %50 = memref.load %arg2[%c8] : memref<36xf32, #tpu.memory_space<smem>>
    %c8_25 = arith.constant 8 : index
    %c0_26 = arith.constant 0 : index
    %c0_27 = arith.constant 0 : index
    %51 = vector.load %arg1[%c8_25, %c0_26, %c0_27] : memref<9x2x784xf32, #tpu.memory_space<vmem>>, vector<1x2x784xf32>
    %52 = vector.shape_cast %51 : vector<1x2x784xf32> to vector<2x784xf32>
    %53 = vector.broadcast %50 : f32 to vector<2x784xf32>
    %54 = arith.mulf %53, %52 : vector<2x784xf32>
    %55 = arith.addf %49, %54 : vector<2x784xf32>
    %c0_28 = arith.constant 0 : index
    %56 = memref.load %arg3[%c0_28] : memref<4xf32, #tpu.memory_space<smem>>
    %57 = vector.broadcast %56 : f32 to vector<2x784xf32>
    %58 = arith.addf %55, %57 : vector<2x784xf32>
    %cst_29 = arith.constant 0.000000e+00 : f32
    %59 = vector.broadcast %cst_29 : f32 to vector<2x784xf32>
    %60 = arith.maximumf %58, %59 : vector<2x784xf32>
    %c0_30 = arith.constant 0 : index
    %c0_31 = arith.constant 0 : index
    %61 = vector.load %arg4[%c0_30, %c0_31] : memref<3136x20xf32, #tpu.memory_space<vmem>>, vector<784x20xf32>
    %cst_32 = arith.constant dense<0.000000e+00> : vector<2x20xf32>
    %62 = tpu.matmul %60, %61, %cst_32 {dimension_numbers = #tpu.dot_dimension_numbers<[1], [0], [0], [1], [0, 0, 1, 1], [], []>} : vector<2x784xf32>, vector<784x20xf32>, vector<2x20xf32> -> vector<2x20xf32>
    %63 = arith.addf %0, %62 : vector<2x20xf32>
    %cst_33 = arith.constant 0.000000e+00 : f32
    %64 = vector.broadcast %cst_33 : f32 to vector<2x784xf32>
    %c9 = arith.constant 9 : index
    %65 = memref.load %arg2[%c9] : memref<36xf32, #tpu.memory_space<smem>>
    %c0_34 = arith.constant 0 : index
    %c0_35 = arith.constant 0 : index
    %c0_36 = arith.constant 0 : index
    %66 = vector.load %arg1[%c0_34, %c0_35, %c0_36] : memref<9x2x784xf32, #tpu.memory_space<vmem>>, vector<1x2x784xf32>
    %67 = vector.shape_cast %66 : vector<1x2x784xf32> to vector<2x784xf32>
    %68 = vector.broadcast %65 : f32 to vector<2x784xf32>
    %69 = arith.mulf %68, %67 : vector<2x784xf32>
    %70 = arith.addf %64, %69 : vector<2x784xf32>
    %c10 = arith.constant 10 : index
    %71 = memref.load %arg2[%c10] : memref<36xf32, #tpu.memory_space<smem>>
    %c1_37 = arith.constant 1 : index
    %c0_38 = arith.constant 0 : index
    %c0_39 = arith.constant 0 : index
    %72 = vector.load %arg1[%c1_37, %c0_38, %c0_39] : memref<9x2x784xf32, #tpu.memory_space<vmem>>, vector<1x2x784xf32>
    %73 = vector.shape_cast %72 : vector<1x2x784xf32> to vector<2x784xf32>
    %74 = vector.broadcast %71 : f32 to vector<2x784xf32>
    %75 = arith.mulf %74, %73 : vector<2x784xf32>
    %76 = arith.addf %70, %75 : vector<2x784xf32>
    %c11 = arith.constant 11 : index
    %77 = memref.load %arg2[%c11] : memref<36xf32, #tpu.memory_space<smem>>
    %c2_40 = arith.constant 2 : index
    %c0_41 = arith.constant 0 : index
    %c0_42 = arith.constant 0 : index
    %78 = vector.load %arg1[%c2_40, %c0_41, %c0_42] : memref<9x2x784xf32, #tpu.memory_space<vmem>>, vector<1x2x784xf32>
    %79 = vector.shape_cast %78 : vector<1x2x784xf32> to vector<2x784xf32>
    %80 = vector.broadcast %77 : f32 to vector<2x784xf32>
    %81 = arith.mulf %80, %79 : vector<2x784xf32>
    %82 = arith.addf %76, %81 : vector<2x784xf32>
    %c12 = arith.constant 12 : index
    %83 = memref.load %arg2[%c12] : memref<36xf32, #tpu.memory_space<smem>>
    %c3_43 = arith.constant 3 : index
    %c0_44 = arith.constant 0 : index
    %c0_45 = arith.constant 0 : index
    %84 = vector.load %arg1[%c3_43, %c0_44, %c0_45] : memref<9x2x784xf32, #tpu.memory_space<vmem>>, vector<1x2x784xf32>
    %85 = vector.shape_cast %84 : vector<1x2x784xf32> to vector<2x784xf32>
    %86 = vector.broadcast %83 : f32 to vector<2x784xf32>
    %87 = arith.mulf %86, %85 : vector<2x784xf32>
    %88 = arith.addf %82, %87 : vector<2x784xf32>
    %c13 = arith.constant 13 : index
    %89 = memref.load %arg2[%c13] : memref<36xf32, #tpu.memory_space<smem>>
    %c4_46 = arith.constant 4 : index
    %c0_47 = arith.constant 0 : index
    %c0_48 = arith.constant 0 : index
    %90 = vector.load %arg1[%c4_46, %c0_47, %c0_48] : memref<9x2x784xf32, #tpu.memory_space<vmem>>, vector<1x2x784xf32>
    %91 = vector.shape_cast %90 : vector<1x2x784xf32> to vector<2x784xf32>
    %92 = vector.broadcast %89 : f32 to vector<2x784xf32>
    %93 = arith.mulf %92, %91 : vector<2x784xf32>
    %94 = arith.addf %88, %93 : vector<2x784xf32>
    %c14 = arith.constant 14 : index
    %95 = memref.load %arg2[%c14] : memref<36xf32, #tpu.memory_space<smem>>
    %c5_49 = arith.constant 5 : index
    %c0_50 = arith.constant 0 : index
    %c0_51 = arith.constant 0 : index
    %96 = vector.load %arg1[%c5_49, %c0_50, %c0_51] : memref<9x2x784xf32, #tpu.memory_space<vmem>>, vector<1x2x784xf32>
    %97 = vector.shape_cast %96 : vector<1x2x784xf32> to vector<2x784xf32>
    %98 = vector.broadcast %95 : f32 to vector<2x784xf32>
    %99 = arith.mulf %98, %97 : vector<2x784xf32>
    %100 = arith.addf %94, %99 : vector<2x784xf32>
    %c15 = arith.constant 15 : index
    %101 = memref.load %arg2[%c15] : memref<36xf32, #tpu.memory_space<smem>>
    %c6_52 = arith.constant 6 : index
    %c0_53 = arith.constant 0 : index
    %c0_54 = arith.constant 0 : index
    %102 = vector.load %arg1[%c6_52, %c0_53, %c0_54] : memref<9x2x784xf32, #tpu.memory_space<vmem>>, vector<1x2x784xf32>
    %103 = vector.shape_cast %102 : vector<1x2x784xf32> to vector<2x784xf32>
    %104 = vector.broadcast %101 : f32 to vector<2x784xf32>
    %105 = arith.mulf %104, %103 : vector<2x784xf32>
    %106 = arith.addf %100, %105 : vector<2x784xf32>
    %c16 = arith.constant 16 : index
    %107 = memref.load %arg2[%c16] : memref<36xf32, #tpu.memory_space<smem>>
    %c7_55 = arith.constant 7 : index
    %c0_56 = arith.constant 0 : index
    %c0_57 = arith.constant 0 : index
    %108 = vector.load %arg1[%c7_55, %c0_56, %c0_57] : memref<9x2x784xf32, #tpu.memory_space<vmem>>, vector<1x2x784xf32>
    %109 = vector.shape_cast %108 : vector<1x2x784xf32> to vector<2x784xf32>
    %110 = vector.broadcast %107 : f32 to vector<2x784xf32>
    %111 = arith.mulf %110, %109 : vector<2x784xf32>
    %112 = arith.addf %106, %111 : vector<2x784xf32>
    %c17 = arith.constant 17 : index
    %113 = memref.load %arg2[%c17] : memref<36xf32, #tpu.memory_space<smem>>
    %c8_58 = arith.constant 8 : index
    %c0_59 = arith.constant 0 : index
    %c0_60 = arith.constant 0 : index
    %114 = vector.load %arg1[%c8_58, %c0_59, %c0_60] : memref<9x2x784xf32, #tpu.memory_space<vmem>>, vector<1x2x784xf32>
    %115 = vector.shape_cast %114 : vector<1x2x784xf32> to vector<2x784xf32>
    %116 = vector.broadcast %113 : f32 to vector<2x784xf32>
    %117 = arith.mulf %116, %115 : vector<2x784xf32>
    %118 = arith.addf %112, %117 : vector<2x784xf32>
    %c1_61 = arith.constant 1 : index
    %119 = memref.load %arg3[%c1_61] : memref<4xf32, #tpu.memory_space<smem>>
    %120 = vector.broadcast %119 : f32 to vector<2x784xf32>
    %121 = arith.addf %118, %120 : vector<2x784xf32>
    %cst_62 = arith.constant 0.000000e+00 : f32
    %122 = vector.broadcast %cst_62 : f32 to vector<2x784xf32>
    %123 = arith.maximumf %121, %122 : vector<2x784xf32>
    %c784 = arith.constant 784 : index
    %c0_63 = arith.constant 0 : index
    %124 = vector.load %arg4[%c784, %c0_63] : memref<3136x20xf32, #tpu.memory_space<vmem>>, vector<784x20xf32>
    %cst_64 = arith.constant dense<0.000000e+00> : vector<2x20xf32>
    %125 = tpu.matmul %123, %124, %cst_64 {dimension_numbers = #tpu.dot_dimension_numbers<[1], [0], [0], [1], [0, 0, 1, 1], [], []>} : vector<2x784xf32>, vector<784x20xf32>, vector<2x20xf32> -> vector<2x20xf32>
    %126 = arith.addf %63, %125 : vector<2x20xf32>
    %cst_65 = arith.constant 0.000000e+00 : f32
    %127 = vector.broadcast %cst_65 : f32 to vector<2x784xf32>
    %c18 = arith.constant 18 : index
    %128 = memref.load %arg2[%c18] : memref<36xf32, #tpu.memory_space<smem>>
    %c0_66 = arith.constant 0 : index
    %c0_67 = arith.constant 0 : index
    %c0_68 = arith.constant 0 : index
    %129 = vector.load %arg1[%c0_66, %c0_67, %c0_68] : memref<9x2x784xf32, #tpu.memory_space<vmem>>, vector<1x2x784xf32>
    %130 = vector.shape_cast %129 : vector<1x2x784xf32> to vector<2x784xf32>
    %131 = vector.broadcast %128 : f32 to vector<2x784xf32>
    %132 = arith.mulf %131, %130 : vector<2x784xf32>
    %133 = arith.addf %127, %132 : vector<2x784xf32>
    %c19 = arith.constant 19 : index
    %134 = memref.load %arg2[%c19] : memref<36xf32, #tpu.memory_space<smem>>
    %c1_69 = arith.constant 1 : index
    %c0_70 = arith.constant 0 : index
    %c0_71 = arith.constant 0 : index
    %135 = vector.load %arg1[%c1_69, %c0_70, %c0_71] : memref<9x2x784xf32, #tpu.memory_space<vmem>>, vector<1x2x784xf32>
    %136 = vector.shape_cast %135 : vector<1x2x784xf32> to vector<2x784xf32>
    %137 = vector.broadcast %134 : f32 to vector<2x784xf32>
    %138 = arith.mulf %137, %136 : vector<2x784xf32>
    %139 = arith.addf %133, %138 : vector<2x784xf32>
    %c20 = arith.constant 20 : index
    %140 = memref.load %arg2[%c20] : memref<36xf32, #tpu.memory_space<smem>>
    %c2_72 = arith.constant 2 : index
    %c0_73 = arith.constant 0 : index
    %c0_74 = arith.constant 0 : index
    %141 = vector.load %arg1[%c2_72, %c0_73, %c0_74] : memref<9x2x784xf32, #tpu.memory_space<vmem>>, vector<1x2x784xf32>
    %142 = vector.shape_cast %141 : vector<1x2x784xf32> to vector<2x784xf32>
    %143 = vector.broadcast %140 : f32 to vector<2x784xf32>
    %144 = arith.mulf %143, %142 : vector<2x784xf32>
    %145 = arith.addf %139, %144 : vector<2x784xf32>
    %c21 = arith.constant 21 : index
    %146 = memref.load %arg2[%c21] : memref<36xf32, #tpu.memory_space<smem>>
    %c3_75 = arith.constant 3 : index
    %c0_76 = arith.constant 0 : index
    %c0_77 = arith.constant 0 : index
    %147 = vector.load %arg1[%c3_75, %c0_76, %c0_77] : memref<9x2x784xf32, #tpu.memory_space<vmem>>, vector<1x2x784xf32>
    %148 = vector.shape_cast %147 : vector<1x2x784xf32> to vector<2x784xf32>
    %149 = vector.broadcast %146 : f32 to vector<2x784xf32>
    %150 = arith.mulf %149, %148 : vector<2x784xf32>
    %151 = arith.addf %145, %150 : vector<2x784xf32>
    %c22 = arith.constant 22 : index
    %152 = memref.load %arg2[%c22] : memref<36xf32, #tpu.memory_space<smem>>
    %c4_78 = arith.constant 4 : index
    %c0_79 = arith.constant 0 : index
    %c0_80 = arith.constant 0 : index
    %153 = vector.load %arg1[%c4_78, %c0_79, %c0_80] : memref<9x2x784xf32, #tpu.memory_space<vmem>>, vector<1x2x784xf32>
    %154 = vector.shape_cast %153 : vector<1x2x784xf32> to vector<2x784xf32>
    %155 = vector.broadcast %152 : f32 to vector<2x784xf32>
    %156 = arith.mulf %155, %154 : vector<2x784xf32>
    %157 = arith.addf %151, %156 : vector<2x784xf32>
    %c23 = arith.constant 23 : index
    %158 = memref.load %arg2[%c23] : memref<36xf32, #tpu.memory_space<smem>>
    %c5_81 = arith.constant 5 : index
    %c0_82 = arith.constant 0 : index
    %c0_83 = arith.constant 0 : index
    %159 = vector.load %arg1[%c5_81, %c0_82, %c0_83] : memref<9x2x784xf32, #tpu.memory_space<vmem>>, vector<1x2x784xf32>
    %160 = vector.shape_cast %159 : vector<1x2x784xf32> to vector<2x784xf32>
    %161 = vector.broadcast %158 : f32 to vector<2x784xf32>
    %162 = arith.mulf %161, %160 : vector<2x784xf32>
    %163 = arith.addf %157, %162 : vector<2x784xf32>
    %c24 = arith.constant 24 : index
    %164 = memref.load %arg2[%c24] : memref<36xf32, #tpu.memory_space<smem>>
    %c6_84 = arith.constant 6 : index
    %c0_85 = arith.constant 0 : index
    %c0_86 = arith.constant 0 : index
    %165 = vector.load %arg1[%c6_84, %c0_85, %c0_86] : memref<9x2x784xf32, #tpu.memory_space<vmem>>, vector<1x2x784xf32>
    %166 = vector.shape_cast %165 : vector<1x2x784xf32> to vector<2x784xf32>
    %167 = vector.broadcast %164 : f32 to vector<2x784xf32>
    %168 = arith.mulf %167, %166 : vector<2x784xf32>
    %169 = arith.addf %163, %168 : vector<2x784xf32>
    %c25 = arith.constant 25 : index
    %170 = memref.load %arg2[%c25] : memref<36xf32, #tpu.memory_space<smem>>
    %c7_87 = arith.constant 7 : index
    %c0_88 = arith.constant 0 : index
    %c0_89 = arith.constant 0 : index
    %171 = vector.load %arg1[%c7_87, %c0_88, %c0_89] : memref<9x2x784xf32, #tpu.memory_space<vmem>>, vector<1x2x784xf32>
    %172 = vector.shape_cast %171 : vector<1x2x784xf32> to vector<2x784xf32>
    %173 = vector.broadcast %170 : f32 to vector<2x784xf32>
    %174 = arith.mulf %173, %172 : vector<2x784xf32>
    %175 = arith.addf %169, %174 : vector<2x784xf32>
    %c26 = arith.constant 26 : index
    %176 = memref.load %arg2[%c26] : memref<36xf32, #tpu.memory_space<smem>>
    %c8_90 = arith.constant 8 : index
    %c0_91 = arith.constant 0 : index
    %c0_92 = arith.constant 0 : index
    %177 = vector.load %arg1[%c8_90, %c0_91, %c0_92] : memref<9x2x784xf32, #tpu.memory_space<vmem>>, vector<1x2x784xf32>
    %178 = vector.shape_cast %177 : vector<1x2x784xf32> to vector<2x784xf32>
    %179 = vector.broadcast %176 : f32 to vector<2x784xf32>
    %180 = arith.mulf %179, %178 : vector<2x784xf32>
    %181 = arith.addf %175, %180 : vector<2x784xf32>
    %c2_93 = arith.constant 2 : index
    %182 = memref.load %arg3[%c2_93] : memref<4xf32, #tpu.memory_space<smem>>
    %183 = vector.broadcast %182 : f32 to vector<2x784xf32>
    %184 = arith.addf %181, %183 : vector<2x784xf32>
    %cst_94 = arith.constant 0.000000e+00 : f32
    %185 = vector.broadcast %cst_94 : f32 to vector<2x784xf32>
    %186 = arith.maximumf %184, %185 : vector<2x784xf32>
    %c1568 = arith.constant 1568 : index
    %c0_95 = arith.constant 0 : index
    %187 = vector.load %arg4[%c1568, %c0_95] : memref<3136x20xf32, #tpu.memory_space<vmem>>, vector<784x20xf32>
    %cst_96 = arith.constant dense<0.000000e+00> : vector<2x20xf32>
    %188 = tpu.matmul %186, %187, %cst_96 {dimension_numbers = #tpu.dot_dimension_numbers<[1], [0], [0], [1], [0, 0, 1, 1], [], []>} : vector<2x784xf32>, vector<784x20xf32>, vector<2x20xf32> -> vector<2x20xf32>
    %189 = arith.addf %126, %188 : vector<2x20xf32>
    %cst_97 = arith.constant 0.000000e+00 : f32
    %190 = vector.broadcast %cst_97 : f32 to vector<2x784xf32>
    %c27 = arith.constant 27 : index
    %191 = memref.load %arg2[%c27] : memref<36xf32, #tpu.memory_space<smem>>
    %c0_98 = arith.constant 0 : index
    %c0_99 = arith.constant 0 : index
    %c0_100 = arith.constant 0 : index
    %192 = vector.load %arg1[%c0_98, %c0_99, %c0_100] : memref<9x2x784xf32, #tpu.memory_space<vmem>>, vector<1x2x784xf32>
    %193 = vector.shape_cast %192 : vector<1x2x784xf32> to vector<2x784xf32>
    %194 = vector.broadcast %191 : f32 to vector<2x784xf32>
    %195 = arith.mulf %194, %193 : vector<2x784xf32>
    %196 = arith.addf %190, %195 : vector<2x784xf32>
    %c28 = arith.constant 28 : index
    %197 = memref.load %arg2[%c28] : memref<36xf32, #tpu.memory_space<smem>>
    %c1_101 = arith.constant 1 : index
    %c0_102 = arith.constant 0 : index
    %c0_103 = arith.constant 0 : index
    %198 = vector.load %arg1[%c1_101, %c0_102, %c0_103] : memref<9x2x784xf32, #tpu.memory_space<vmem>>, vector<1x2x784xf32>
    %199 = vector.shape_cast %198 : vector<1x2x784xf32> to vector<2x784xf32>
    %200 = vector.broadcast %197 : f32 to vector<2x784xf32>
    %201 = arith.mulf %200, %199 : vector<2x784xf32>
    %202 = arith.addf %196, %201 : vector<2x784xf32>
    %c29 = arith.constant 29 : index
    %203 = memref.load %arg2[%c29] : memref<36xf32, #tpu.memory_space<smem>>
    %c2_104 = arith.constant 2 : index
    %c0_105 = arith.constant 0 : index
    %c0_106 = arith.constant 0 : index
    %204 = vector.load %arg1[%c2_104, %c0_105, %c0_106] : memref<9x2x784xf32, #tpu.memory_space<vmem>>, vector<1x2x784xf32>
    %205 = vector.shape_cast %204 : vector<1x2x784xf32> to vector<2x784xf32>
    %206 = vector.broadcast %203 : f32 to vector<2x784xf32>
    %207 = arith.mulf %206, %205 : vector<2x784xf32>
    %208 = arith.addf %202, %207 : vector<2x784xf32>
    %c30 = arith.constant 30 : index
    %209 = memref.load %arg2[%c30] : memref<36xf32, #tpu.memory_space<smem>>
    %c3_107 = arith.constant 3 : index
    %c0_108 = arith.constant 0 : index
    %c0_109 = arith.constant 0 : index
    %210 = vector.load %arg1[%c3_107, %c0_108, %c0_109] : memref<9x2x784xf32, #tpu.memory_space<vmem>>, vector<1x2x784xf32>
    %211 = vector.shape_cast %210 : vector<1x2x784xf32> to vector<2x784xf32>
    %212 = vector.broadcast %209 : f32 to vector<2x784xf32>
    %213 = arith.mulf %212, %211 : vector<2x784xf32>
    %214 = arith.addf %208, %213 : vector<2x784xf32>
    %c31 = arith.constant 31 : index
    %215 = memref.load %arg2[%c31] : memref<36xf32, #tpu.memory_space<smem>>
    %c4_110 = arith.constant 4 : index
    %c0_111 = arith.constant 0 : index
    %c0_112 = arith.constant 0 : index
    %216 = vector.load %arg1[%c4_110, %c0_111, %c0_112] : memref<9x2x784xf32, #tpu.memory_space<vmem>>, vector<1x2x784xf32>
    %217 = vector.shape_cast %216 : vector<1x2x784xf32> to vector<2x784xf32>
    %218 = vector.broadcast %215 : f32 to vector<2x784xf32>
    %219 = arith.mulf %218, %217 : vector<2x784xf32>
    %220 = arith.addf %214, %219 : vector<2x784xf32>
    %c32 = arith.constant 32 : index
    %221 = memref.load %arg2[%c32] : memref<36xf32, #tpu.memory_space<smem>>
    %c5_113 = arith.constant 5 : index
    %c0_114 = arith.constant 0 : index
    %c0_115 = arith.constant 0 : index
    %222 = vector.load %arg1[%c5_113, %c0_114, %c0_115] : memref<9x2x784xf32, #tpu.memory_space<vmem>>, vector<1x2x784xf32>
    %223 = vector.shape_cast %222 : vector<1x2x784xf32> to vector<2x784xf32>
    %224 = vector.broadcast %221 : f32 to vector<2x784xf32>
    %225 = arith.mulf %224, %223 : vector<2x784xf32>
    %226 = arith.addf %220, %225 : vector<2x784xf32>
    %c33 = arith.constant 33 : index
    %227 = memref.load %arg2[%c33] : memref<36xf32, #tpu.memory_space<smem>>
    %c6_116 = arith.constant 6 : index
    %c0_117 = arith.constant 0 : index
    %c0_118 = arith.constant 0 : index
    %228 = vector.load %arg1[%c6_116, %c0_117, %c0_118] : memref<9x2x784xf32, #tpu.memory_space<vmem>>, vector<1x2x784xf32>
    %229 = vector.shape_cast %228 : vector<1x2x784xf32> to vector<2x784xf32>
    %230 = vector.broadcast %227 : f32 to vector<2x784xf32>
    %231 = arith.mulf %230, %229 : vector<2x784xf32>
    %232 = arith.addf %226, %231 : vector<2x784xf32>
    %c34 = arith.constant 34 : index
    %233 = memref.load %arg2[%c34] : memref<36xf32, #tpu.memory_space<smem>>
    %c7_119 = arith.constant 7 : index
    %c0_120 = arith.constant 0 : index
    %c0_121 = arith.constant 0 : index
    %234 = vector.load %arg1[%c7_119, %c0_120, %c0_121] : memref<9x2x784xf32, #tpu.memory_space<vmem>>, vector<1x2x784xf32>
    %235 = vector.shape_cast %234 : vector<1x2x784xf32> to vector<2x784xf32>
    %236 = vector.broadcast %233 : f32 to vector<2x784xf32>
    %237 = arith.mulf %236, %235 : vector<2x784xf32>
    %238 = arith.addf %232, %237 : vector<2x784xf32>
    %c35 = arith.constant 35 : index
    %239 = memref.load %arg2[%c35] : memref<36xf32, #tpu.memory_space<smem>>
    %c8_122 = arith.constant 8 : index
    %c0_123 = arith.constant 0 : index
    %c0_124 = arith.constant 0 : index
    %240 = vector.load %arg1[%c8_122, %c0_123, %c0_124] : memref<9x2x784xf32, #tpu.memory_space<vmem>>, vector<1x2x784xf32>
    %241 = vector.shape_cast %240 : vector<1x2x784xf32> to vector<2x784xf32>
    %242 = vector.broadcast %239 : f32 to vector<2x784xf32>
    %243 = arith.mulf %242, %241 : vector<2x784xf32>
    %244 = arith.addf %238, %243 : vector<2x784xf32>
    %c3_125 = arith.constant 3 : index
    %245 = memref.load %arg3[%c3_125] : memref<4xf32, #tpu.memory_space<smem>>
    %246 = vector.broadcast %245 : f32 to vector<2x784xf32>
    %247 = arith.addf %244, %246 : vector<2x784xf32>
    %cst_126 = arith.constant 0.000000e+00 : f32
    %248 = vector.broadcast %cst_126 : f32 to vector<2x784xf32>
    %249 = arith.maximumf %247, %248 : vector<2x784xf32>
    %c2352 = arith.constant 2352 : index
    %c0_127 = arith.constant 0 : index
    %250 = vector.load %arg4[%c2352, %c0_127] : memref<3136x20xf32, #tpu.memory_space<vmem>>, vector<784x20xf32>
    %cst_128 = arith.constant dense<0.000000e+00> : vector<2x20xf32>
    %251 = tpu.matmul %249, %250, %cst_128 {dimension_numbers = #tpu.dot_dimension_numbers<[1], [0], [0], [1], [0, 0, 1, 1], [], []>} : vector<2x784xf32>, vector<784x20xf32>, vector<2x20xf32> -> vector<2x20xf32>
    %252 = arith.addf %189, %251 : vector<2x20xf32>
    %c0_129 = arith.constant 0 : index
    %c0_130 = arith.constant 0 : index
    %253 = vector.load %arg5[%c0_129, %c0_130] : memref<1x20xf32, #tpu.memory_space<vmem>>, vector<1x20xf32>
    %254 = vector.broadcast %253 : vector<1x20xf32> to vector<2x20xf32>
    %255 = arith.addf %252, %254 : vector<2x20xf32>
    %c0_131 = arith.constant 0 : index
    %c0_132 = arith.constant 0 : index
    %256 = vector.load %arg6[%c0_131, %c0_132] : memref<20x10xf32, #tpu.memory_space<vmem>>, vector<20x10xf32>
    %cst_133 = arith.constant dense<0.000000e+00> : vector<2x10xf32>
    %257 = tpu.matmul %255, %256, %cst_133 {dimension_numbers = #tpu.dot_dimension_numbers<[1], [0], [0], [1], [0, 0, 1, 1], [], []>} : vector<2x20xf32>, vector<20x10xf32>, vector<2x10xf32> -> vector<2x10xf32>
    %c0_134 = arith.constant 0 : index
    %c0_135 = arith.constant 0 : index
    %258 = vector.load %arg7[%c0_134, %c0_135] : memref<1x10xf32, #tpu.memory_space<vmem>>, vector<1x10xf32>
    %259 = vector.broadcast %258 : vector<1x10xf32> to vector<2x10xf32>
    %260 = arith.addf %257, %259 : vector<2x10xf32>
    %c0_136 = arith.constant 0 : index
    %c0_137 = arith.constant 0 : index
    %261 = vector.load %arg8[%c0_136, %c0_137] : memref<2x10xf32, #tpu.memory_space<vmem>>, vector<2x10xf32>
    tpu.vector_store %arg8[%c0_136, %c0_137], %260 {strides = array<i32>} : memref<2x10xf32, #tpu.memory_space<vmem>>, vector<2x10xf32>,
    return
  }
  func.func @transform_0(%arg0: i32) -> (i32, i32, i32) {
    %c0_i32 = arith.constant 0 : i32
    %c0_i32_0 = arith.constant 0 : i32
    %c0_i32_1 = arith.constant 0 : i32
    return %c0_i32, %arg0, %c0_i32_0 : i32, i32, i32
  }
  func.func @transform_1(%arg0: i32) -> i32 {
    %c0_i32 = arith.constant 0 : i32
    %c0_i32_0 = arith.constant 0 : i32
    return %c0_i32 : i32
  }
  func.func @transform_2(%arg0: i32) -> i32 {
    %c0_i32 = arith.constant 0 : i32
    %c0_i32_0 = arith.constant 0 : i32
    return %c0_i32 : i32
  }
  func.func @transform_3(%arg0: i32) -> (i32, i32) {
    %c0_i32 = arith.constant 0 : i32
    %c0_i32_0 = arith.constant 0 : i32
    %c0_i32_1 = arith.constant 0 : i32
    return %c0_i32, %c0_i32_0 : i32, i32
  }
  func.func @transform_4(%arg0: i32) -> (i32, i32) {
    %c0_i32 = arith.constant 0 : i32
    %c0_i32_0 = arith.constant 0 : i32
    %c0_i32_1 = arith.constant 0 : i32
    return %c0_i32, %c0_i32_0 : i32, i32
  }
  func.func @transform_5(%arg0: i32) -> (i32, i32) {
    %c0_i32 = arith.constant 0 : i32
    %c0_i32_0 = arith.constant 0 : i32
    %c0_i32_1 = arith.constant 0 : i32
    return %c0_i32, %c0_i32_0 : i32, i32
  }
  func.func @transform_6(%arg0: i32) -> (i32, i32) {
    %c0_i32 = arith.constant 0 : i32
    %c0_i32_0 = arith.constant 0 : i32
    %c0_i32_1 = arith.constant 0 : i32
    return %c0_i32, %c0_i32_0 : i32, i32
  }
  func.func @transform_7(%arg0: i32) -> (i32, i32) {
    %c0_i32 = arith.constant 0 : i32
    %c0_i32_0 = arith.constant 0 : i32
    return %arg0, %c0_i32 : i32, i32
  }
}

</mosaic_0001>

<bundles_post_ra>
// kernel: tpu_custom_call.1
= control target key start
LH: loop header
LB: loop body
LE: loop exit
PB: predicated region body
PF: predicated region fallthrough
CT: control target
= control target key end

     0   :  { %12 = vsyncpa [#allocation4], 0  ;;  %s4983_s0 = inlined_call_operand.vmem [shape: f32[9,2,784], index: 0, kind: input, shape index: {}]   ;;  %s4984_s1 = inlined_call_operand.vmem [shape: f32[36], index: 1, kind: input, shape index: {}]   ;;  %s4985_s2 = inlined_call_operand.vmem [shape: f32[4], index: 2, kind: input, shape index: {}]   ;;  %s4986_s3 = inlined_call_operand.vmem [shape: f32[3136,20], index: 3, kind: input, shape index: {}]   ;;  %s4987_s4 = inlined_call_operand.vmem [shape: f32[1,20], index: 4, kind: input, shape index: {}]   ;;  %s4988_s5 = inlined_call_operand.vmem [shape: f32[20,10], index: 5, kind: input, shape index: {}]   ;;  %s4989_s6 = inlined_call_operand.vmem [shape: f32[1,10], index: 6, kind: input, shape index: {}]   ;;  %s4990_s7 = inlined_call_operand.hbm [shape: f32[2,10], index: 7, kind: output, shape index: {}]  }
   0x1   :  { %13 = vsyncpa [#allocation6], 0 }
   0x2   :  { %14 = vsyncpa [#allocation3], 0  ;;  %s23_s26 = sshll.u32 %s4984_s1, 4  ;;  %s33_s29 = sshll.u32 %s4985_s2, 4  ;;  %s24_s26 = int_to_ptr.vmem [resolvable:$true] %s23_s26  ;;  %s34_s29 = int_to_ptr.vmem [resolvable:$true] %s33_s29 }
   0x3   :  { %s3067_s30 = scalar_lea.vmem %s24_s26, 16  ;;  %p3072_p1 = scmp.lt.s32.totalorder %s24_s26, %s24_s26 }
   0x4   :  { %p3068_p0 = scmp.ne.s32.totalorder %s24_s26, %s3067_s30  ;;  %p3073_p2 = scmp.lt.s32.totalorder %s3067_s30, %s3067_s30 }
   0x6   :  { %p3074_p3 = por %p3073_p2, %p3072_p1 }
   0x8   :  { %p3075_p4 = pnand %p3074_p3, %p3068_p0 }
   0xa   :  { %3078 = shalt.err (!%p3075_p4)
}
   0xb   :  { %s3119_s8 = smov [#allocation2]   ;;  %s3079_s9 = scalar_lea.vmem %s34_s29, 16 }
   0xc   :  { %26 = dma.vmem_to_smem %s24_s26, 16, %s3119_s8, [#allocation4]  }
   0xd   :  { %p3080_p5 = scmp.ne.s32.totalorder %s34_s29, %s3079_s9  ;;  %p3084_p6 = scmp.lt.s32.totalorder %s34_s29, %s34_s29 }
   0xe   :  { %p3085_p7 = scmp.lt.s32.totalorder %s3079_s9, %s3079_s9 }
  0x10   :  { %p3086_p8 = por %p3085_p7, %p3084_p6 }
  0x12   :  { %p3087_p9 = pnand %p3086_p8, %p3080_p5 }
  0x14   :  { %3090 = shalt.err (!%p3087_p9)
}
  0x15   :  { %s3120_s1 = smov [#allocation5]  }
  0x16   :  { %36 = dma.vmem_to_smem %s34_s29, 16, %s3120_s1, [#allocation6]  }
  0x17   :  { %3113 = dma.done.wait [#allocation4], 16  }
  0x18   :  { %3114 = vsyncadd [#allocation4], 4294967280 }
  0x19   :  { %3115 = dma.done.wait [#allocation6], 16  }
  0x1a   :  { %3116 = vsyncadd [#allocation6], 4294967280 }
  0x1b   :  { %51 = sfence }
  0x1c   :  { %v312_v0 = vld [vmem:[%s4986_s3 + $0x390] sm:$0xff]  ;;  %v313_v1 = vld [vmem:[%s4986_s3 + $0x398] sm:$0xff]  ;;  %v314_v11 = vld [vmem:[%s4986_s3 + $0x3a0] sm:$0xff]  ;;  %s3226_s20 = sld [smem:[#allocation2 + $0x9]]  ;;  %s3237_s27 = sld [smem:[#allocation2 + $0xa]]  ;;  %vm3123_vm0 = vmmov 0  }
  0x1d   :  { %v344_v2 = vld [vmem:[%s4986_s3 + $0x490] sm:$0xff]  ;;  %v2654_v3 = vpack.c.bf16 %v313_v1, %v312_v0  ;;  %v345_v4 = vld [vmem:[%s4986_s3 + $0x498] sm:$0xff]  ;;  %v315_v13 = vld [vmem:[%s4986_s3 + $0x3a8] sm:$0xff]  ;;  %s3248_s2 = sld [smem:[#allocation2 + $0xb]]  ;;  %s3259_s16 = sld [smem:[#allocation2 + $0xc]]  ;;  %vm435_vm1 = vcmask 130048  }
  0x1e   :  { %v296_v5 = vld [vmem:[%s4986_s3 + $0x310] sm:$0xff]  ;;  %v297_v6 = vld [vmem:[%s4986_s3 + $0x318] sm:$0xff]  ;;  %v2686_v7 = vpack.c.bf16 %v345_v4, %v344_v2  ;;  %v346_v14 = vld [vmem:[%s4986_s3 + $0x4a0] sm:$0xff]  ;;  %v2658_v16 = vpack.c.bf16 %v315_v13, %v314_v11  ;;  %s3270_s24 = sld [smem:[#allocation2 + $0xd]]  ;;  %s3281_s9 = sld [smem:[#allocation2 + $0xe]]  ;;  %vm2027_vm2 = vcmask 1043456  }
  0x1f   :  { %v2656_v8 = vpack.c.bf16 %v297_v6, %v296_v5  ;;  %v328_v9 = vld [vmem:[%s4986_s3 + $0x410] sm:$0xff]  ;;  %v329_v10 = vld [vmem:[%s4986_s3 + $0x418] sm:$0xff]  ;;  %2655 = vmatprep.subr.bf16.mxu0 %v2654_v3  ;;  %v347_v15 = vld [vmem:[%s4986_s3 + $0x4a8] sm:$0xff]  ;;  %s3292_s15 = sld [smem:[#allocation2 + $0xf]]  ;;  %s3294_s17 = sld [smem:[#allocation2 + $0x10]]  ;;  %vm2023_vm3 = vcmask 162816  }
  0x20   :  { %v2688_v12 = vpack.c.bf16 %v329_v10, %v328_v9  ;;  %2687 = vmatprep.subr.bf16.mxu1 %v2686_v7  ;;  %v2690_v17 = vpack.c.bf16 %v347_v15, %v346_v14  ;;  %v298_v18 = vld [vmem:[%s4986_s3 + $0x320] sm:$0xff]  ;;  %v299_v19 = vld [vmem:[%s4986_s3 + $0x328] sm:$0xff]  ;;  %v316_v23 = vld [vmem:[%s4986_s3 + $0x3b0] sm:$0xff]  ;;  %s3306_s26 = sld [smem:[#allocation2]]  ;;  %s3318_s11 = sld [smem:[#allocation2 + $0x1]]  ;;  %vm2101_vm4 = vcmask 74752  }
  0x21   :  { %2657 = vmatpush3.bf16.msra.mxu0 %v2656_v8  ;;  %v330_v20 = vld [vmem:[%s4986_s3 + $0x420] sm:$0xff]  ;;  %v2660_v21 = vpack.c.bf16 %v299_v19, %v298_v18  ;;  %v331_v22 = vld [vmem:[%s4986_s3 + $0x428] sm:$0xff]  ;;  %v317_v24 = vld [vmem:[%s4986_s3 + $0x3b8] sm:$0xff]  ;;  %s3358_s18 = sld [smem:[#allocation2 + $0x2]]  ;;  %s3374_s29 = sld [smem:[#allocation2 + $0x3]] }
  0x22   :  { %2689 = vmatpush3.bf16.msra.mxu1 %v2688_v12  ;;  %2659 = vmatprep.subr.bf16.mxu0 %v2658_v16  ;;  %v2692_v25 = vpack.c.bf16 %v331_v22, %v330_v20  ;;  %v2662_v26 = vpack.c.bf16 %v317_v24, %v316_v23  ;;  %v348_v27 = vld [vmem:[%s4986_s3 + $0x4b0] sm:$0xff]  ;;  %v349_v28 = vld [vmem:[%s4986_s3 + $0x4b8] sm:$0xff]  ;;  %v318_v35 = vld [vmem:[%s4986_s3 + $0x3c0] sm:$0xff]  ;;  %v237_v56 = vstv %s3226_s20  ;;  %s3392_s14 = sld [smem:[#allocation2 + $0x11]]  ;;  %v400_v22 = vlaneseq  ;;  %s3435_s22 = sld [smem:[#allocation2 + $0x4]] }
  0x23   :  { %2691 = vmatprep.subr.bf16.mxu1 %v2690_v17  ;;  %v300_v29 = vld [vmem:[%s4986_s3 + $0x330] sm:$0xff]  ;;  %v2694_v30 = vpack.c.bf16 %v349_v28, %v348_v27  ;;  %v301_v31 = vld [vmem:[%s4986_s3 + $0x338] sm:$0xff]  ;;  %v319_v36 = vld [vmem:[%s4986_s3 + $0x3c8] sm:$0xff]  ;;  %v243_v61 = vstv %s3237_s27  ;;  %s3461_s10 = sld [smem:[#allocation2 + $0x5]]  ;;  %s3529_s23 = sld [smem:[#allocation2 + $0x6]] }
  0x24   :  { %v332_v32 = vld [vmem:[%s4986_s3 + $0x430] sm:$0xff]  ;;  %v333_v33 = vld [vmem:[%s4986_s3 + $0x438] sm:$0xff]  ;;  %v2664_v34 = vpack.c.bf16 %v301_v31, %v300_v29  ;;  %v350_v37 = vld [vmem:[%s4986_s3 + $0x4c0] sm:$0xff]  ;;  %v2666_v39 = vpack.c.bf16 %v319_v36, %v318_v35  ;;  %v249_v1 = vstv %s3248_s2  ;;  %s3552_s27 = sld [smem:[#allocation2 + $0x7]]  ;;  %s3587_s20 = sld [smem:[#allocation5 + $0x1]] }
  0x25   :  { %2661 = vmatpush3.bf16.msra.mxu0 %v2660_v21  ;;  %v2696_v38 = vpack.c.bf16 %v333_v33, %v332_v32  ;;  %v351_v40 = vld [vmem:[%s4986_s3 + $0x4c8] sm:$0xff]  ;;  %v302_v41 = vld [vmem:[%s4986_s3 + $0x340] sm:$0xff]  ;;  %v320_v46 = vld [vmem:[%s4986_s3 + $0x3d0] sm:$0xff]  ;;  %v255_v6 = vstv %s3259_s16  ;;  %s3679_s2 = sld [smem:[#allocation2 + $0x12]]  ;;  %s3742_s8 = sld [smem:[#allocation2 + $0x16]] }
  0x26   :  { %2693 = vmatpush3.bf16.msra.mxu1 %v2692_v25  ;;  %2663 = vmatprep.subr.bf16.mxu0 %v2662_v26  ;;  %v303_v42 = vld [vmem:[%s4986_s3 + $0x348] sm:$0xff]  ;;  %v2698_v43 = vpack.c.bf16 %v351_v40, %v350_v37  ;;  %v334_v44 = vld [vmem:[%s4986_s3 + $0x440] sm:$0xff]  ;;  %v321_v47 = vld [vmem:[%s4986_s3 + $0x3d8] sm:$0xff]  ;;  %v261_v12 = vstv %s3270_s24  ;;  %s3704_s24 = sld [smem:[#allocation2 + $0x14]]  ;;  %s3804_s25 = sld [smem:[#allocation2 + $0x18]] }
  0x27   :  { %2695 = vmatprep.subr.bf16.mxu1 %v2694_v30  ;;  %v335_v45 = vld [vmem:[%s4986_s3 + $0x448] sm:$0xff]  ;;  %v352_v48 = vld [vmem:[%s4986_s3 + $0x4d0] sm:$0xff]  ;;  %v353_v49 = vld [vmem:[%s4986_s3 + $0x4d8] sm:$0xff]  ;;  %v2668_v50 = vpack.c.bf16 %v303_v42, %v302_v41  ;;  %v2670_v52 = vpack.c.bf16 %v321_v47, %v320_v46  ;;  %v267_v17 = vstv %s3281_s9  ;;  %s3579_s9 = sld [smem:[#allocation2 + $0x8]]  ;;  %s3878_s16 = sld [smem:[#allocation2 + $0x1b]] }
  0x28   :  { %v2700_v51 = vpack.c.bf16 %v335_v45, %v334_v44  ;;  %v304_v53 = vld [vmem:[%s4986_s3 + $0x350] sm:$0xff]  ;;  %v305_v54 = vld [vmem:[%s4986_s3 + $0x358] sm:$0xff]  ;;  %v2702_v57 = vpack.c.bf16 %v353_v49, %v352_v48  ;;  %v322_v59 = vld [vmem:[%s4986_s3 + $0x3e0] sm:$0xff]  ;;  %v273_v21 = vstv %s3292_s15  ;;  %s3626_s15 = sld [smem:[#allocation5]]  ;;  %s3895_s1 = sld [smem:[#allocation2 + $0x1c]] }
  0x29   :  { %2665 = vmatpush3.bf16.msra.mxu0 %v2664_v34  ;;  %v336_v55 = vld [vmem:[%s4986_s3 + $0x450] sm:$0xff]  ;;  %v337_v58 = vld [vmem:[%s4986_s3 + $0x458] sm:$0xff]  ;;  %v323_v60 = vld [vmem:[%s4986_s3 + $0x3e8] sm:$0xff]  ;;  %v2672_v2 = vpack.c.bf16 %v305_v54, %v304_v53  ;;  %v279_v27 = vstv %s3294_s17  ;;  %s3691_s17 = sld [smem:[#allocation2 + $0x13]] }
  0x2a   :  { %2697 = vmatpush3.bf16.msra.mxu1 %v2696_v38  ;;  %2667 = vmatprep.subr.bf16.mxu0 %v2666_v39  ;;  %v354_v62 = vld [vmem:[%s4986_s3 + $0x4e0] sm:$0xff]  ;;  %v355_v63 = vld [vmem:[%s4986_s3 + $0x4e8] sm:$0xff]  ;;  %v2704_v7 = vpack.c.bf16 %v337_v58, %v336_v55  ;;  %v2674_v8 = vpack.c.bf16 %v323_v60, %v322_v59  ;;  %v324_v9 = vld [vmem:[%s4986_s3 + $0x3f0] sm:$0xff]  ;;  %v55_v35 = vstv %s3306_s26  ;;  %s3851_s26 = sld [smem:[#allocation2 + $0x1a]] }
  0x2b   :  { %2699 = vmatprep.subr.bf16.mxu1 %v2698_v43  ;;  %v3329_v0 = vld [vmem:[%s4986_s3 + $0x360] sm:$0xff]  ;;  %v307_v3 = vld [vmem:[%s4986_s3 + $0x368] sm:$0xff]  ;;  %v325_v10 = vld [vmem:[%s4986_s3 + $0x3f8] sm:$0xff]  ;;  %v2706_v13 = vpack.c.bf16 %v355_v63, %v354_v62  ;;  %v64_v42 = vstv %s3318_s11  ;;  %s3955_s11 = sld [smem:[#allocation2 + $0x1f]] }
  0x2c   :  { %v3338_v4 = vld [vmem:[%s4986_s3 + $0x460] sm:$0xff]  ;;  %v3343_v5 = vld [vmem:[%s4986_s3 + $0x468] sm:$0xff]  ;;  %v3355_v11 = vld [vmem:[%s4986_s3 + $0x4f0] sm:$0xff]  ;;  %v2676_v23 = vpack.c.bf16 %v307_v3, %v3329_v0  ;;  %v2678_v29 = vpack.c.bf16 %v325_v10, %v324_v9  ;;  %v73_v63 = vstv %s3358_s18  ;;  %s3989_s18 = sld [smem:[#allocation2 + $0x20]] }
  0x2d   :  { %2669 = vmatpush3.bf16.msra.mxu0 %v2668_v50  ;;  %v357_v14 = vld [vmem:[%s4986_s3 + $0x4f8] sm:$0xff]  ;;  %v3366_v15 = vld [vmem:[%s4986_s3 + $0x370] sm:$0xff]  ;;  %v3389_v20 = vld [vmem:[%s4986_s3 + $0x400] sm:$0xff]  ;;  %v2708_v28 = vpack.c.bf16 %v3343_v5, %v3338_v4  ;;  %v82_v3 = vstv %s3374_s29  ;;  %s3758_s29 = sld [smem:[#allocation2 + $0x17]] }
  0x2e   :  { %2701 = vmatpush3.bf16.msra.mxu1 %v2700_v51  ;;  %2671 = vmatprep.subr.bf16.mxu0 %v2670_v52  ;;  %v3371_v16 = vld [vmem:[%s4986_s3 + $0x378] sm:$0xff]  ;;  %v3379_v18 = vld [vmem:[%s4986_s3 + $0x470] sm:$0xff]  ;;  %v3398_v24 = vld [vmem:[%s4986_s3 + $0x408] sm:$0xff]  ;;  %v2710_v30 = vpack.c.bf16 %v357_v14, %v3355_v11 }
  0x2f   :  { %2703 = vmatprep.subr.bf16.mxu1 %v2702_v57  ;;  %v3384_v19 = vld [vmem:[%s4986_s3 + $0x478] sm:$0xff]  ;;  %v3403_v25 = vld [vmem:[%s4986_s3 + $0x500] sm:$0xff]  ;;  %v3408_v26 = vld [vmem:[%s4986_s3 + $0x508] sm:$0xff]  ;;  %v2680_v36 = vpack.c.bf16 %v3371_v16, %v3366_v15  ;;  %v2682_v50 = vpack.c.bf16 %v3398_v24, %v3389_v20  ;;  %v285_v24 = vstv %s3392_s14  ;;  %s3915_s14 = sld [smem:[#allocation2 + $0x1d]] }
  0x30   :  { %v3417_v31 = vld [vmem:[%s4986_s3 + $0x380] sm:$0xff]  ;;  %v3422_v32 = vld [vmem:[%s4986_s3 + $0x388] sm:$0xff]  ;;  %v3447_v38 = vld [vmem:[%s4983_s0 + $0x16] sm:$0x3f]  ;;  %v2712_v43 = vpack.c.bf16 %v3384_v19, %v3379_v18  ;;  %v2714_v51 = vpack.c.bf16 %v3408_v26, %v3403_v25 }
  0x31   :  { %2673 = vmatpush3.bf16.msra.mxu0 %v2672_v2  ;;  %v3427_v33 = vld [vmem:[%s4983_s0] sm:$0xff]  ;;  %v3432_v34 = vld [vmem:[%s4983_s0 + $0x8] sm:$0x3f]  ;;  %v3442_v37 = vld [vmem:[%s4983_s0 + $0xe] sm:$0xff]  ;;  %v245_v48 = vmul.f32 %v3447_v38, %v243_v61  ;;  %v2684_v0 = vpack.c.bf16 %v3422_v32, %v3417_v31 }
  0x32   :  { %2705 = vmatpush3.bf16.msra.mxu1 %v2704_v7  ;;  %2675 = vmatprep.subr.bf16.mxu0 %v2674_v8  ;;  %v3452_v39 = vld [vmem:[%s4983_s0 + $0x1c] sm:$0xff]  ;;  %v238_v40 = vmul.f32 %v237_v56, %v3427_v33  ;;  %v239_v41 = vmul.f32 %v237_v56, %v3432_v34  ;;  %v3468_v44 = vld [vmem:[%s4983_s0 + $0x24] sm:$0x3f]  ;;  %v3473_v45 = vld [vmem:[%s4983_s0 + $0x2a] sm:$0xff]  ;;  %v244_v47 = vmul.f32 %v3442_v37, %v243_v61 }
  0x33   :  { %2707 = vmatprep.subr.bf16.mxu1 %v2706_v13  ;;  %v3478_v46 = vld [vmem:[%s4983_s0 + $0x32] sm:$0x3f]  ;;  %v250_v49 = vmul.f32 %v3452_v39, %v249_v1  ;;  %v342_v52 = vld [vmem:[%s4986_s3 + $0x480] sm:$0xff]  ;;  %v3499_v53 = vld [vmem:[%s4983_s0 + $0x38] sm:$0xff]  ;;  %v251_v55 = vmul.f32 %v3468_v44, %v249_v1  ;;  %v256_v56 = vmul.f32 %v3473_v45, %v255_v6  ;;  %v56_v1 = vmul.f32 %v55_v35, %v3427_v33 }
  0x34   :  { %v3504_v54 = vld [vmem:[%s4983_s0 + $0x40] sm:$0x3f]  ;;  %v343_v57 = vld [vmem:[%s4986_s3 + $0x488] sm:$0xff]  ;;  %v246_v60 = vadd.f32 %v244_v47, %v238_v40  ;;  %v247_v61 = vadd.f32 %v245_v48, %v239_v41  ;;  %v257_v62 = vmul.f32 %v3478_v46, %v255_v6  ;;  %v65_v2 = vmul.f32 %v3442_v37, %v64_v42  ;;  %v376_v8 = vld [vmem:[%s4986_s3 + $0x590] sm:$0xff] }
  0x35   :  { %2677 = vmatpush3.bf16.msra.mxu0 %v2676_v23  ;;  %v3518_v58 = vld [vmem:[%s4983_s0 + $0x46] sm:$0xff]  ;;  %v3523_v59 = vld [vmem:[%s4983_s0 + $0x4e] sm:$0x3f]  ;;  %v262_v6 = vmul.f32 %v3499_v53, %v261_v12  ;;  %v263_v7 = vmul.f32 %v3504_v54, %v261_v12  ;;  %v377_v9 = vld [vmem:[%s4986_s3 + $0x598] sm:$0xff]  ;;  %v2716_v10 = vpack.c.bf16 %v343_v57, %v342_v52  ;;  %v74_v15 = vmul.f32 %v3452_v39, %v73_v63 }
  0x36   :  { %2709 = vmatpush3.bf16.msra.mxu1 %v2708_v28  ;;  %2679 = vmatprep.subr.bf16.mxu0 %v2678_v29  ;;  %v252_v4 = vadd.f32 %v250_v49, %v246_v60  ;;  %v253_v5 = vadd.f32 %v251_v55, %v247_v61  ;;  %v3557_v11 = vld [vmem:[%s4983_s0 + $0x54] sm:$0xff]  ;;  %v3562_v12 = vld [vmem:[%s4983_s0 + $0x5c] sm:$0x3f]  ;;  %v268_v13 = vmul.f32 %v3518_v58, %v267_v17  ;;  %v3576_v16 = vld [vmem:[%s4983_s0 + $0x62] sm:$0xff]  ;;  %v91_v23 = vstv %s3435_s22  ;;  %s3721_s22 = sld [smem:[#allocation2 + $0x15]] }
  0x37   :  { %2711 = vmatprep.subr.bf16.mxu1 %v2710_v30  ;;  %v269_v14 = vmul.f32 %v3523_v59, %v267_v17  ;;  %v2718_v20 = vpack.c.bf16 %v377_v9, %v376_v8  ;;  %v3584_v17 = vld [vmem:[%s4983_s0 + $0x6a] sm:$0x3f]  ;;  %v67_v25 = vadd.f32 %v65_v2, %v56_v1  ;;  %v83_v26 = vmul.f32 %v3473_v45, %v82_v3  ;;  %v3596_v29 = vld [vmem:[%s4983_s0 + $0x70] sm:$0xff]  ;;  %v3607_v40 = vld [vmem:[%s4983_s0 + $0x78] sm:$0x3f] }
  0x38   :  { %v258_v18 = vadd.f32 %v256_v56, %v252_v4  ;;  %v259_v19 = vadd.f32 %v257_v62, %v253_v5  ;;  %v100_v28 = vstv %s3461_s10  ;;  %v274_v32 = vmul.f32 %v3557_v11, %v273_v21  ;;  %s4075_s10 = sld [smem:[#allocation5 + $0x2]] }
  0x39   :  { %2681 = vmatpush3.bf16.msra.mxu0 %v2680_v36  ;;  %v275_v36 = vmul.f32 %v3562_v12, %v273_v21  ;;  %v280_v41 = vmul.f32 %v3576_v16, %v279_v27  ;;  %v76_v48 = vadd.f32 %v74_v15, %v67_v25  ;;  %v92_v49 = vmul.f32 %v3499_v53, %v91_v23 }
  0x3a   :  { %2713 = vmatpush3.bf16.msra.mxu1 %v2712_v43  ;;  %2683 = vmatprep.subr.bf16.mxu0 %v2682_v50  ;;  %v264_v30 = vadd.f32 %v262_v6, %v258_v18  ;;  %v265_v31 = vadd.f32 %v263_v7, %v259_v19  ;;  %v3121_v43 = vmov 1983009808   ;;  %v109_v52 = vstv %s3529_s23  ;;  %s4012_s23 = sld [smem:[#allocation2 + $0x22]] }
  0x3b   :  { %2715 = vmatprep.subr.bf16.mxu1 %v2714_v51  ;;  %v398_v47 = vunpack.c.l.s4 %v3121_v43  ;;  %v281_v51 = vmul.f32 %v3584_v17, %v279_v27  ;;  %v286_v55 = vmul.f32 %v3596_v29, %v285_v24  ;;  %v3122_v56 = vmov 0.0|0.0   ;;  %v360_v43 = vld [vmem:[%s4986_s3 + $0x510] sm:$0xff] }
  0x3c   :  { %v270_v50 = vadd.f32 %v268_v13, %v264_v30  ;;  %v271_v21 = vadd.f32 %v269_v14, %v265_v31  ;;  %v85_v57 = vadd.f32 %v83_v26, %v76_v48  ;;  %v101_v60 = vmul.f32 %v3518_v58, %v100_v28 }
  0x3d   :  { %2685 = vmatpush3.bf16.msra.mxu0 %v2684_v0  ;;  %v287_v0 = vmul.f32 %v3607_v40, %v285_v24  ;;  %v118_v27 = vstv %s3552_s27  ;;  %v401_v1 = vshrl.u32 %v400_v22, 7  ;;  %v110_v4 = vmul.f32 %v3557_v11, %v109_v52  ;;  %s3834_s27 = sld [smem:[#allocation2 + $0x19]] }
  0x3e   :  { %2717 = vmatpush3.bf16.msra.mxu1 %v2716_v10  ;;  %2719 = vmatprep.subr.bf16.mxu0 %v2718_v20  ;;  %v276_v61 = vadd.f32 %v274_v32, %v270_v50  ;;  %v277_v62 = vadd.f32 %v275_v36, %v271_v21  ;;  %v94_v2 = vadd.f32 %v92_v49, %v85_v57  ;;  %v399_v7 = vunpack.c.0.s8 %v398_v47  ;;  %v379_v50 = vld [vmem:[%s4986_s3 + $0x5a8] sm:$0xff]  ;;  %v393_v57 = vld [vmem:[%s4986_s3 + $0x618] sm:$0xff] }
  0x3f   :  { %2750 = vmatprep.subr.bf16.mxu1 %v3122_v56  ;;  %v127_v8 = vstv %s3579_s9  ;;  %v291_v9 = vstv %s3587_s20  ;;  %v119_v13 = vmul.f32 %v3576_v16, %v118_v27  ;;  %v57_v22 = vmul.f32 %v55_v35, %v3432_v34  ;;  %s3941_s20 = sld [smem:[#allocation2 + $0x1e]] }
  0x40   :  { %v282_v5 = vadd.f32 %v280_v41, %v276_v61  ;;  %v283_v6 = vadd.f32 %v281_v51, %v277_v62  ;;  %v103_v10 = vadd.f32 %v101_v60, %v94_v2  ;;  %v128_v19 = vmul.f32 %v3596_v29, %v127_v8  ;;  %v155_v2 = vld [vmem:[%s4986_s3 + $0x88] sm:$0xff] }
  0x41   :  { %v66_v20 = vmul.f32 %v3447_v38, %v64_v42  ;;  %v3646_v26 = vsub.s32 %v399_v7, %v401_v1  ;;  %v75_v30 = vmul.f32 %v3468_v44, %v73_v63  ;;  %v133_v35 = vstv %s3626_s15  ;;  %v361_v42 = vld [vmem:[%s4986_s3 + $0x518] sm:$0xff]  ;;  %v378_v63 = vld [vmem:[%s4986_s3 + $0x5a0] sm:$0xff]  ;;  %v363_v7 = vld [vmem:[%s4986_s3 + $0x528] sm:$0xff] }
  0x42   :  { %v288_v14 = vadd.f32 %v286_v55, %v282_v5  ;;  %v289_v15 = vadd.f32 %v287_v0, %v283_v6  ;;  %v112_v18 = vadd.f32 %v110_v4, %v103_v10  ;;  %v84_v51 = vmul.f32 %v3478_v46, %v82_v3  ;;  %v392_v55 = vld [vmem:[%s4986_s3 + $0x610] sm:$0xff]  ;;  %v154_v3 = vld [vmem:[%s4986_s3 + $0x80] sm:$0xff]  ;;  %v381_v10 = vld [vmem:[%s4986_s3 + $0x5b8] sm:$0xff] }
  0x43   :  { %v68_v32 = vadd.f32 %v66_v20, %v57_v22  ;;  %v2720_v1 = vpack.c.bf16 %v361_v42, %v360_v43  ;;  %v362_v4 = vld [vmem:[%s4986_s3 + $0x520] sm:$0xff]  ;;  %v2722_v6 = vpack.c.bf16 %v379_v50, %v378_v63  ;;  %v364_v43 = vld [vmem:[%s4986_s3 + $0x530] sm:$0xff]  ;;  %v365_v42 = vld [vmem:[%s4986_s3 + $0x538] sm:$0xff]  ;;  %v3124_v63 = vmov 0.0  }
  0x44   :  { %v292_v24 = vadd.f32 %v291_v9, %v288_v14  ;;  %v293_v25 = vadd.f32 %v291_v9, %v289_v15  ;;  %v121_v31 = vadd.f32 %v119_v13, %v112_v18  ;;  %v380_v9 = vld [vmem:[%s4986_s3 + $0x5b0] sm:$0xff]  ;;  %v2751_v15 = vpack.c.bf16 %v393_v57, %v392_v55  ;;  %v138_v20 = vld [vmem:[%s4986_s3] sm:$0xff] }
  0x45   :  { %v77_v21 = vadd.f32 %v75_v30, %v68_v32  ;;  %v93_v18 = vmul.f32 %v3504_v54, %v91_v23  ;;  %v2724_v23 = vpack.c.bf16 %v363_v7, %v362_v4  ;;  %v156_v32 = vld [vmem:[%s4986_s3 + $0x90] sm:$0xff]  ;;  %v142_v7 = vld [vmem:[%s4986_s3 + $0x20] sm:$0xff] }
  0x46   :  { %v294_v36 = vmax.f32 %v292_v24, 0.0  ;;  %v295_v41 = vmax.f32 %v293_v25, 0.0  ;;  %v130_v47 = vadd.f32 %v128_v19, %v121_v31  ;;  %v2753_v19 = vpack.c.bf16 %v155_v2, %v154_v3  ;;  %v139_v24 = vld [vmem:[%s4986_s3 + $0x8] sm:$0xff] }
  0x47   :  { %v86_v22 = vadd.f32 %v84_v51, %v77_v21  ;;  %v2726_v31 = vpack.c.bf16 %v381_v10, %v380_v9  ;;  %v2755_v50 = vpack.c.bf16 %v139_v24, %v138_v20  ;;  %v141_v21 = vld [vmem:[%s4986_s3 + $0x18] sm:$0xff]  ;;  %v382_v51 = vld [vmem:[%s4986_s3 + $0x5c0] sm:$0xff]  ;;  %v1048_v3 = vstv %s3691_s17  ;;  %s4022_s17 = sld [smem:[#allocation2 + $0x23]] }
  0x48   :  { %v403_v48 = vrot.slane %v294_v36, %v3646_v26  ;;  %v396_v49 = vcombine.high %v294_v36, %v294_v36  ;;  %v3675_v60 = vrot.slane %v295_v41, %v3646_v26  ;;  %v134_v61 = vadd.f32 %v133_v35, %v130_v47  ;;  %v157_v36 = vld [vmem:[%s4986_s3 + $0x98] sm:$0xff]  ;;  %v140_v47 = vld [vmem:[%s4986_s3 + $0x10] sm:$0xff] }
  0x49   :  { %v413_v5 = vcombine.high %v295_v41, %v295_v41  ;;  %v2757_v57 = vpack.c.bf16 %v157_v36, %v156_v32  ;;  %v2759_v2 = vpack.c.bf16 %v141_v21, %v140_v47  ;;  %v1054_v10 = vstv %s3704_s24  ;;  %v160_v32 = vld [vmem:[%s4986_s3 + $0xb0] sm:$0xff]  ;;  %v386_v21 = vld [vmem:[%s4986_s3 + $0x5e0] sm:$0xff] }
  0x4a   :  { %v411_v62 = vcombine.high %v403_v48, %v403_v48  ;;  %v410_v0 = vrot.slane %v396_v49, %v3646_v26  ;;  %v3702_v13 = vmax.f32 %v134_v61, 0.0  ;;  %v428_v25 = vcombine.high %v3675_v60, %v3675_v60  ;;  %v368_v47 = vld [vmem:[%s4986_s3 + $0x550] sm:$0xff] }
  0x4b   :  { %v427_v41 = vrot.slane %v413_v5, %v3646_v26  ;;  %v102_v49 = vmul.f32 %v3523_v59, %v100_v28  ;;  %v383_v28 = vld [vmem:[%s4986_s3 + $0x5c8] sm:$0xff]  ;;  %v1042_v61 = vstv %s3679_s2  ;;  %v366_v5 = vld [vmem:[%s4986_s3 + $0x540] sm:$0xff]  ;;  %v1050_v36 = vmul.f32 %v3447_v38, %v1048_v3 }
  0x4c   :  { %502 = vmatprep.mubr.f32.mxu0 %v411_v62  ;;  %v412_v14 = vcombine.high %v410_v0, %v410_v0  ;;  %v3719_v30 = vrot.slane %v3702_v13, %v3646_v26  ;;  %v2728_v62 = vpack.c.bf16 %v365_v42, %v364_v43  ;;  %v2730_v4 = vpack.c.bf16 %v383_v28, %v382_v51  ;;  %v387_v51 = vld [vmem:[%s4986_s3 + $0x5e8] sm:$0xff] }
  0x4d   :  { %503 = vmatmul.mubr.f32.vlgmr.msra.gmra.mrb[0].mxu0 %v403_v48  ;;  %v95_v48 = vadd.f32 %v93_v18, %v86_v22  ;;  %v385_v22 = vld [vmem:[%s4986_s3 + $0x5d8] sm:$0xff]  ;;  %v111_v18 = vmul.f32 %v3562_v12, %v109_v52  ;;  %v1044_v20 = vmul.f32 %v1042_v61, %v3432_v34 }
  0x4e   :  { %572 = vmatprep.mubr.f32.mxu1 %v412_v14  ;;  %2721 = vmatpush3.bf16.msra.mxu0 %v2720_v1  ;;  %v735_v55 = vcombine.high %v3719_v30, %v3719_v30  ;;  %v159_v1 = vld [vmem:[%s4986_s3 + $0xa8] sm:$0xff]  ;;  %v161_v52 = vld [vmem:[%s4986_s3 + $0xb8] sm:$0xff] }
  0x4f   :  { %573 = vmatmul.mubr.f32.vlgmr.msra.gmra.mrb[0].mxu1 %v410_v0  ;;  %2723 = vmatprep.subr.bf16.mxu0 %v2722_v6  ;;  %v158_v0 = vld [vmem:[%s4986_s3 + $0xa0] sm:$0xff]  ;;  %v367_v6 = vld [vmem:[%s4986_s3 + $0x548] sm:$0xff]  ;;  %v104_v9 = vadd.f32 %v102_v49, %v95_v48  ;;  %v369_v48 = vld [vmem:[%s4986_s3 + $0x558] sm:$0xff] }
  0x50   :  { %2752 = vmatpush3.bf16.msra.mxu1 %v2751_v15  ;;  %2621 = vmatprep.mubr.msk.f32.mxu1 %vm3123_vm0, %v3124_v63  ;;  %v143_v14 = vld [vmem:[%s4986_s3 + $0x28] sm:$0xff]  ;;  %v384_v15 = vld [vmem:[%s4986_s3 + $0x5d0] sm:$0xff]  ;;  %v2761_v24 = vpack.c.bf16 %v159_v1, %v158_v0  ;;  %v145_v1 = vld [vmem:[%s4986_s3 + $0x38] sm:$0xff] }
  0x51   :  { %2754 = vmatprep.subr.bf16.mxu1 %v2753_v19  ;;  %642 = vmatprep.mubr.f32.mxu0 %v428_v25  ;;  %v1043_v19 = vmul.f32 %v1042_v61, %v3427_v33  ;;  %v1049_v25 = vmul.f32 %v3442_v37, %v1048_v3  ;;  %v2763_v43 = vpack.c.bf16 %v143_v14, %v142_v7  ;;  %v144_v0 = vld [vmem:[%s4986_s3 + $0x30] sm:$0xff]  ;;  %v371_v14 = vld [vmem:[%s4986_s3 + $0x568] sm:$0xff] }
  0x52   :  { %2725 = vmatpush3.bf16.msra.mxu0 %v2724_v23  ;;  %v1060_v23 = vstv %s3721_s22  ;;  %v2734_v42 = vpack.c.bf16 %v385_v22, %v384_v15  ;;  %v113_v28 = vadd.f32 %v111_v18, %v104_v9  ;;  %v2738_v7 = vpack.c.bf16 %v387_v51, %v386_v21  ;;  %v370_v9 = vld [vmem:[%s4986_s3 + $0x560] sm:$0xff]  ;;  %v388_v18 = vld [vmem:[%s4986_s3 + $0x5f0] sm:$0xff]  ;;  %v391_v51 = vld [vmem:[%s4986_s3 + $0x608] sm:$0xff] }
  0x53   :  { %2622 = vmatmul.mubr.msk.f32.vlgmr.msra.gmra.mrb[2].mxu1 %vm435_vm1, %v427_v41  ;;  %2727 = vmatprep.subr.bf16.mxu0 %v2726_v31  ;;  %v2732_v31 = vpack.c.bf16 %v367_v6, %v366_v5  ;;  %v1055_v41 = vmul.f32 %v3452_v39, %v1054_v10  ;;  %v1051_v49 = vadd.f32 %v1049_v25, %v1043_v19  ;;  %v163_v5 = vld [vmem:[%s4986_s3 + $0xc8] sm:$0xff]  ;;  %v389_v19 = vld [vmem:[%s4986_s3 + $0x5f8] sm:$0xff]  ;;  %v390_v21 = vld [vmem:[%s4986_s3 + $0x600] sm:$0xff] }
  0x54   :  { %2756 = vmatpush3.bf16.msra.mxu1 %v2755_v50  ;;  %825 = vmatprep.mubr.f32.mxu1 %v735_v55  ;;  %v1066_v50 = vstv %s3742_s8  ;;  %v120_v55 = vmul.f32 %v3584_v17, %v118_v27  ;;  %v1061_v61 = vmul.f32 %v3473_v45, %v1060_v23  ;;  %v2736_v27 = vpack.c.bf16 %v369_v48, %v368_v47  ;;  %v372_v47 = vld [vmem:[%s4986_s3 + $0x570] sm:$0xff]  ;;  %v373_v48 = vld [vmem:[%s4986_s3 + $0x578] sm:$0xff] }
  0x55   :  { %2758 = vmatprep.subr.bf16.mxu1 %v2757_v57  ;;  %v3822_v57 = vadd.f32 %v1050_v36, %v1044_v20  ;;  %v1057_v3 = vadd.f32 %v1055_v41, %v1051_v49  ;;  %v1067_v6 = vmul.f32 %v3499_v53, %v1066_v50  ;;  %v2767_v22 = vpack.c.bf16 %v145_v1, %v144_v0  ;;  %v148_v0 = vld [vmem:[%s4986_s3 + $0x50] sm:$0xff]  ;;  %v149_v1 = vld [vmem:[%s4986_s3 + $0x58] sm:$0xff] }
  0x56   :  { %2729 = vmatpush3.bf16.msra.mxu0 %v2728_v62  ;;  %v2765_v62 = vpack.c.bf16 %v161_v52, %v160_v32  ;;  %v122_v20 = vadd.f32 %v120_v55, %v113_v28  ;;  %v146_v32 = vld [vmem:[%s4986_s3 + $0x40] sm:$0xff]  ;;  %v147_v52 = vld [vmem:[%s4986_s3 + $0x48] sm:$0xff]  ;;  %v2740_v36 = vpack.c.bf16 %v371_v14, %v370_v9  ;;  %v2746_v14 = vpack.c.bf16 %v391_v51, %v390_v21 }
  0x57   :  { %2731 = vmatprep.subr.bf16.mxu0 %v2730_v4  ;;  %v162_v4 = vld [vmem:[%s4986_s3 + $0xc0] sm:$0xff]  ;;  %v1063_v15 = vadd.f32 %v1061_v61, %v1057_v3  ;;  %v2771_v49 = vpack.c.bf16 %v147_v52, %v146_v32  ;;  %v1084_v3 = vstv %s3834_s27  ;;  %v171_v21 = vld [vmem:[%s4986_s3 + $0x108] sm:$0xff] }
  0x58   :  { %2760 = vmatpush3.bf16.msra.mxu1 %v2759_v2  ;;  %v1072_v2 = vstv %s3758_s29  ;;  %v1085_v9 = vmul.f32 %v3576_v16, %v1084_v3  ;;  %v150_v52 = vld [vmem:[%s4986_s3 + $0x60] sm:$0xff] }
  0x59   :  { %2762 = vmatprep.subr.bf16.mxu1 %v2761_v24  ;;  %v129_v24 = vmul.f32 %v3607_v40, %v127_v8  ;;  %v1073_v25 = vmul.f32 %v3518_v58, %v1072_v2  ;;  %v164_v40 = vld [vmem:[%s4986_s3 + $0xd0] sm:$0xff]  ;;  %v165_v8 = vld [vmem:[%s4986_s3 + $0xd8] sm:$0xff]  ;;  %v1069_v41 = vadd.f32 %v1067_v6, %v1063_v15  ;;  %v720_v6 = vcombine.high %v3702_v13, %v3702_v13  ;;  %v374_v15 = vld [vmem:[%s4986_s3 + $0x580] sm:$0xff] }
  0x5a   :  { %2733 = vmatpush3.bf16.msra.mxu0 %v2732_v31  ;;  %v2769_v31 = vpack.c.bf16 %v163_v5, %v162_v4  ;;  %v166_v4 = vld [vmem:[%s4986_s3 + $0xe0] sm:$0xff]  ;;  %v167_v5 = vld [vmem:[%s4986_s3 + $0xe8] sm:$0xff] }
  0x5b   :  { %2735 = vmatprep.subr.bf16.mxu0 %v2734_v42  ;;  %v2742_v42 = vpack.c.bf16 %v389_v19, %v388_v18  ;;  %v131_v28 = vadd.f32 %v129_v24, %v122_v20  ;;  %v1075_v55 = vadd.f32 %v1073_v25, %v1069_v41  ;;  %v1090_v18 = vstv %s3851_s26  ;;  %v186_v13 = vld [vmem:[%s4986_s3 + $0x180] sm:$0xff]  ;;  %v187_v20 = vld [vmem:[%s4986_s3 + $0x188] sm:$0xff] }
  0x5c   :  { %2764 = vmatpush3.bf16.msra.mxu1 %v2763_v43  ;;  %v1078_v43 = vstv %s3804_s25  ;;  %v2775_v19 = vpack.c.bf16 %v149_v1, %v148_v0  ;;  %v2777_v32 = vpack.c.bf16 %v167_v5, %v166_v4  ;;  %v3950_v41 = vrot.slane %v720_v6, %v3646_v26  ;;  %v218_v6 = vld [vmem:[%s4986_s3 + $0x280] sm:$0xff]  ;;  %s4421_s25 = sld [smem:[#allocation5 + $0x3]] }
  0x5d   :  { %2766 = vmatprep.subr.bf16.mxu1 %v2765_v62  ;;  %v1079_v61 = vmul.f32 %v3557_v11, %v1078_v43  ;;  %v2773_v62 = vpack.c.bf16 %v165_v8, %v164_v40  ;;  %v135_v24 = vadd.f32 %v133_v35, %v131_v28  ;;  %v168_v35 = vld [vmem:[%s4986_s3 + $0xf0] sm:$0xff]  ;;  %v169_v8 = vld [vmem:[%s4986_s3 + $0xf8] sm:$0xff]  ;;  %v1530_v0 = vstv %s3895_s1 }
  0x5e   :  { %2737 = vmatpush3.bf16.msra.mxu0 %v2736_v27  ;;  %v2744_v27 = vpack.c.bf16 %v373_v48, %v372_v47  ;;  %v1524_v47 = vstv %s3878_s16  ;;  %v2785_v48 = vpack.c.bf16 %v187_v20, %v186_v13  ;;  %v2781_v1 = vpack.c.bf16 %v169_v8, %v168_v35  ;;  %s3997_s16 = sld [smem:[#allocation2 + $0x21]]  ;;  %v190_v20 = vld [vmem:[%s4986_s3 + $0x1a0] sm:$0xff] }
  0x5f   :  { %2739 = vmatprep.subr.bf16.mxu0 %v2738_v7  ;;  %v1081_v7 = vadd.f32 %v1079_v61, %v1075_v55  ;;  %v1525_v51 = vmul.f32 %v1524_v47, %v3427_v33  ;;  %v188_v55 = vld [vmem:[%s4986_s3 + $0x190] sm:$0xff]  ;;  %v189_v61 = vld [vmem:[%s4986_s3 + $0x198] sm:$0xff]  ;;  %v1531_v4 = vmul.f32 %v3442_v37, %v1530_v0  ;;  %v1548_v8 = vstv %s3955_s11 }
  0x60   :  { %2768 = vmatpush3.bf16.msra.mxu1 %v2767_v22  ;;  %v375_v22 = vld [vmem:[%s4986_s3 + $0x588] sm:$0xff]  ;;  %v152_v33 = vld [vmem:[%s4986_s3 + $0x70] sm:$0xff] }
  0x61   :  { %2770 = vmatprep.subr.bf16.mxu1 %v2769_v31  ;;  %v1087_v25 = vadd.f32 %v1085_v9, %v1081_v7  ;;  %v1091_v31 = vmul.f32 %v3596_v29, %v1090_v18  ;;  %v2748_v40 = vpack.c.bf16 %v375_v22, %v374_v15  ;;  %v219_v7 = vld [vmem:[%s4986_s3 + $0x288] sm:$0xff]  ;;  %v736_v9 = vcombine.high %v3950_v41, %v3950_v41  ;;  %v172_v37 = vld [vmem:[%s4986_s3 + $0x110] sm:$0xff]  ;;  %v173_v22 = vld [vmem:[%s4986_s3 + $0x118] sm:$0xff] }
  0x62   :  { %2741 = vmatpush3.bf16.msra.mxu0 %v2740_v36  ;;  %v151_v36 = vld [vmem:[%s4986_s3 + $0x68] sm:$0xff]  ;;  %v2789_v15 = vpack.c.bf16 %v189_v61, %v188_v55  ;;  %v2791_v35 = vpack.c.bf16 %v173_v22, %v172_v37  ;;  %v176_v37 = vld [vmem:[%s4986_s3 + $0x130] sm:$0xff]  ;;  %v177_v22 = vld [vmem:[%s4986_s3 + $0x138] sm:$0xff] }
  0x63   :  { %2743 = vmatprep.subr.bf16.mxu0 %v2742_v42  ;;  %v3952_v42 = vadd.f32 %v1091_v31, %v1087_v25  ;;  %v2779_v28 = vpack.c.bf16 %v151_v36, %v150_v52  ;;  %v202_v52 = vld [vmem:[%s4986_s3 + $0x200] sm:$0xff]  ;;  %v203_v36 = vld [vmem:[%s4986_s3 + $0x208] sm:$0xff] }
  0x64   :  { %2772 = vmatpush3.bf16.msra.mxu1 %v2771_v49  ;;  %v170_v49 = vld [vmem:[%s4986_s3 + $0x100] sm:$0xff]  ;;  %v2819_v55 = vpack.c.bf16 %v203_v36, %v202_v52  ;;  %v1566_v52 = vstv %s4012_s23 }
  0x65   :  { %2774 = vmatprep.subr.bf16.mxu1 %v2773_v62  ;;  %v3970_v62 = vmax.f32 %v135_v24, 0.0  ;;  %v2787_v5 = vpack.c.bf16 %v171_v21, %v170_v49  ;;  %v191_v24 = vld [vmem:[%s4986_s3 + $0x1a8] sm:$0xff]  ;;  %v1532_v49 = vmul.f32 %v3447_v38, %v1530_v0  ;;  %v193_v38 = vld [vmem:[%s4986_s3 + $0x1b8] sm:$0xff]  ;;  %v206_v36 = vld [vmem:[%s4986_s3 + $0x220] sm:$0xff] }
  0x66   :  { %2745 = vmatpush3.bf16.msra.mxu0 %v2744_v27  ;;  %v153_v27 = vld [vmem:[%s4986_s3 + $0x78] sm:$0xff]  ;;  %v2793_v21 = vpack.c.bf16 %v191_v24, %v190_v20  ;;  %v195_v24 = vld [vmem:[%s4986_s3 + $0x1c8] sm:$0xff] }
  0x67   :  { %2747 = vmatprep.subr.bf16.mxu0 %v2746_v14  ;;  %v1536_v14 = vstv %s3915_s14  ;;  %v2783_v13 = vpack.c.bf16 %v153_v27, %v152_v33  ;;  %v4007_v25 = vrot.slane %v3970_v62, %v3646_v26  ;;  %v204_v33 = vld [vmem:[%s4986_s3 + $0x210] sm:$0xff]  ;;  %v205_v27 = vld [vmem:[%s4986_s3 + $0x218] sm:$0xff]  ;;  %s3125_s14 = smov [#allocation7]  }
  0x68   :  { %2776 = vmatpush3.bf16.msra.mxu1 %v2775_v19  ;;  %v1533_v19 = vadd.f32 %v1531_v4, %v1525_v51  ;;  %v1537_v31 = vmul.f32 %v3452_v39, %v1536_v14  ;;  %v220_v39 = vld [vmem:[%s4986_s3 + $0x290] sm:$0xff]  ;;  %v174_v51 = vld [vmem:[%s4986_s3 + $0x120] sm:$0xff]  ;;  %v1549_v4 = vmul.f32 %v3499_v53, %v1548_v8  ;;  %v2823_v20 = vpack.c.bf16 %v205_v27, %v204_v33  ;;  %v209_v33 = vld [vmem:[%s4986_s3 + $0x238] sm:$0xff]  ;;  %s2109_s9 = sshll.u32 %s3125_s14, 4  ;;  %s2110_s9 = int_to_ptr.vmem [resolvable:$true] %s2109_s9 }
  0x69   :  { %2778 = vmatprep.subr.bf16.mxu1 %v2777_v32  ;;  %v2817_v32 = vpack.c.bf16 %v219_v7, %v218_v6  ;;  %v223_v6 = vld [vmem:[%s4986_s3 + $0x2a8] sm:$0xff]  ;;  %s3091_s8 = scalar_lea.vmem %s2110_s9, 32  ;;  %p3096_p11 = scmp.lt.s32.totalorder %s2110_s9, %s2110_s9 }
  0x6a   :  { %2749 = vmatpush3.bf16.msra.mxu0 %v2748_v40  ;;  %v1542_v40 = vstv %s3941_s20  ;;  %v1539_v61 = vadd.f32 %v1537_v31, %v1533_v19  ;;  %p3092_p10 = scmp.ne.s32.totalorder %s2110_s9, %s3091_s8  ;;  %p3097_p12 = scmp.lt.s32.totalorder %s3091_s8, %s3091_s8 }
  0x6b   :  { %2786 = vmatprep.subr.bf16.mxu0 %v2785_v48  ;;  %v1526_v48 = vmul.f32 %v1524_v47, %v3432_v34  ;;  %v192_v34 = vld [vmem:[%s4986_s3 + $0x1b0] sm:$0xff]  ;;  %v752_v47 = vcombine.high %v4007_v25, %v4007_v25  ;;  %v1543_v0 = vmul.f32 %v3473_v45, %v1542_v40  ;;  %v222_v45 = vld [vmem:[%s4986_s3 + $0x2a0] sm:$0xff] }
  0x6c   :  { %2780 = vmatpush3.bf16.msra.mxu1 %v2779_v28  ;;  %v175_v28 = vld [vmem:[%s4986_s3 + $0x128] sm:$0xff]  ;;  %v2797_v53 = vpack.c.bf16 %v193_v38, %v192_v34  ;;  %v196_v38 = vld [vmem:[%s4986_s3 + $0x1d0] sm:$0xff]  ;;  %p3098_p13 = por %p3097_p12, %p3096_p11 }
  0x6d   :  { %643 = vmatmul.mubr.f32.vlgmr.msra.gmra.mrb[2].mxu0 %v3675_v60  ;;  %2782 = vmatprep.subr.bf16.mxu1 %v2781_v1  ;;  %v221_v60 = vld [vmem:[%s4986_s3 + $0x298] sm:$0xff]  ;;  %v1545_v7 = vadd.f32 %v1543_v0, %v1539_v61 }
  0x6e   :  { %2788 = vmatpush3.bf16.msra.mxu0 %v2787_v5  ;;  %895 = vmatprep.mubr.f32.mxu0 %v736_v9  ;;  %v2821_v1 = vpack.c.bf16 %v221_v60, %v220_v39  ;;  %v2795_v5 = vpack.c.bf16 %v175_v28, %v174_v51  ;;  %v1554_v9 = vstv %s3989_s18  ;;  %v1572_v39 = vstv %s4022_s17  ;;  %v178_v28 = vld [vmem:[%s4986_s3 + $0x140] sm:$0xff]  ;;  %p3099_p0 = pnand %p3098_p13, %p3092_p10 }
  0x6f   :  { %2790 = vmatprep.subr.bf16.mxu0 %v2789_v15  ;;  %v4066_v15 = vadd.f32 %v1532_v49, %v1526_v48  ;;  %v1555_v19 = vmul.f32 %v3518_v58, %v1554_v9  ;;  %v1551_v31 = vadd.f32 %v1549_v4, %v1545_v7  ;;  %v2825_v58 = vpack.c.bf16 %v223_v6, %v222_v45  ;;  %v224_v48 = vld [vmem:[%s4986_s3 + $0x2b0] sm:$0xff]  ;;  %v226_v4 = vld [vmem:[%s4986_s3 + $0x2c0] sm:$0xff]  ;;  %v181_v7 = vld [vmem:[%s4986_s3 + $0x158] sm:$0xff] }
  0x70   :  { %2784 = vmatpush3.bf16.msra.mxu1 %v2783_v13  ;;  %v1560_v13 = vstv %s3997_s16  ;;  %v2799_v60 = vpack.c.bf16 %v177_v22, %v176_v37  ;;  %v1573_v61 = vmul.f32 %v3596_v29, %v1572_v39  ;;  %v227_v29 = vld [vmem:[%s4986_s3 + $0x2c8] sm:$0xff]  ;;  %v180_v6 = vld [vmem:[%s4986_s3 + $0x150] sm:$0xff]  ;;  %v198_v22 = vld [vmem:[%s4986_s3 + $0x1e0] sm:$0xff] }
  0x71   :  { %2818 = vmatprep.subr.bf16.mxu1 %v2817_v32  ;;  %v1561_v32 = vmul.f32 %v3557_v11, %v1560_v13  ;;  %v225_v11 = vld [vmem:[%s4986_s3 + $0x2b8] sm:$0xff]  ;;  %v1557_v49 = vadd.f32 %v1555_v19, %v1551_v31  ;;  %v199_v19 = vld [vmem:[%s4986_s3 + $0x1e8] sm:$0xff] }
  0x72   :  { %2792 = vmatpush3.bf16.msra.mxu0 %v2791_v35  ;;  %v207_v35 = vld [vmem:[%s4986_s3 + $0x228] sm:$0xff]  ;;  %v2829_v0 = vpack.c.bf16 %v225_v11, %v224_v48  ;;  %v182_v48 = vld [vmem:[%s4986_s3 + $0x160] sm:$0xff] }
  0x73   :  { %826 = vmatmul.mubr.f32.vlgmr.msra.gmra.mrb[4].mxu1 %v3719_v30  ;;  %2794 = vmatprep.subr.bf16.mxu0 %v2793_v21  ;;  %v194_v30 = vld [vmem:[%s4986_s3 + $0x1c0] sm:$0xff]  ;;  %v1567_v21 = vmul.f32 %v3576_v16, %v1566_v52  ;;  %v2827_v34 = vpack.c.bf16 %v207_v35, %v206_v36  ;;  %v197_v16 = vld [vmem:[%s4986_s3 + $0x1d8] sm:$0xff]  ;;  %v211_v31 = vld [vmem:[%s4986_s3 + $0x248] sm:$0xff] }
  0x74   :  { %2820 = vmatpush3.bf16.msra.mxu1 %v2819_v55  ;;  %965 = vmatprep.mubr.f32.mxu1 %v752_v47  ;;  %v2801_v51 = vpack.c.bf16 %v195_v24, %v194_v30  ;;  %v179_v55 = vld [vmem:[%s4986_s3 + $0x148] sm:$0xff]  ;;  %v1563_v47 = vadd.f32 %v1561_v32, %v1557_v49  ;;  %v2805_v45 = vpack.c.bf16 %v197_v16, %v196_v38  ;;  %v210_v24 = vld [vmem:[%s4986_s3 + $0x240] sm:$0xff]  ;;  %v229_v36 = vld [vmem:[%s4986_s3 + $0x2d8] sm:$0xff] }
  0x75   :  { %2822 = vmatprep.subr.bf16.mxu1 %v2821_v1  ;;  %v208_v1 = vld [vmem:[%s4986_s3 + $0x230] sm:$0xff]  ;;  %v2803_v27 = vpack.c.bf16 %v179_v55, %v178_v28  ;;  %v2833_v30 = vpack.c.bf16 %v227_v29, %v226_v4  ;;  %v2807_v32 = vpack.c.bf16 %v181_v7, %v180_v6  ;;  %v183_v11 = vld [vmem:[%s4986_s3 + $0x168] sm:$0xff]  ;;  %v2835_v49 = vpack.c.bf16 %v211_v31, %v210_v24  ;;  %v230_v16 = vld [vmem:[%s4986_s3 + $0x2e0] sm:$0xff] }
  0x76   :  { %2796 = vmatpush3.bf16.msra.mxu0 %v2795_v5  ;;  %v1569_v5 = vadd.f32 %v1567_v21, %v1563_v47  ;;  %v2831_v37 = vpack.c.bf16 %v209_v33, %v208_v1  ;;  %v200_v21 = vld [vmem:[%s4986_s3 + $0x1f0] sm:$0xff]  ;;  %v2811_v38 = vpack.c.bf16 %v183_v11, %v182_v48  ;;  %v1117_v33 = vld [vmem:[%s4986_s3 + $0x6a0] sm:$0xff]  ;;  %v1062_v29 = vmul.f32 %v3478_v46, %v1060_v23  ;;  %v215_v6 = vld [vmem:[%s4986_s3 + $0x268] sm:$0xff] }
  0x77   :  { %2798 = vmatprep.subr.bf16.mxu0 %v2797_v53  ;;  %v1096_v53 = vstv %s4075_s10  ;;  %v212_v55 = vld [vmem:[%s4986_s3 + $0x250] sm:$0xff]  ;;  %v233_v46 = vld [vmem:[%s4986_s3 + $0x2f8] sm:$0xff] }
  0x78   :  { %2824 = vmatpush3.bf16.msra.mxu1 %v2823_v20  ;;  %v4147_v20 = vadd.f32 %v1573_v61, %v1569_v5  ;;  %v1097_v35 = vadd.f32 %v1096_v53, %v3952_v42  ;;  %v201_v42 = vld [vmem:[%s4986_s3 + $0x1f8] sm:$0xff]  ;;  %v184_v61 = vld [vmem:[%s4986_s3 + $0x170] sm:$0xff] }
  0x79   :  { %2826 = vmatprep.subr.bf16.mxu1 %v2825_v58  ;;  %v228_v58 = vld [vmem:[%s4986_s3 + $0x2d0] sm:$0xff]  ;;  %v2813_v47 = vpack.c.bf16 %v201_v42, %v200_v21  ;;  %v1120_v31 = vld [vmem:[%s4986_s3 + $0x6b8] sm:$0xff]  ;;  %v1121_v42 = vld [vmem:[%s4986_s3 + $0x6c0] sm:$0xff] }
  0x7a   :  { %2800 = vmatpush3.bf16.msra.mxu0 %v2799_v60  ;;  %v2809_v60 = vpack.c.bf16 %v199_v19, %v198_v22  ;;  %v2837_v28 = vpack.c.bf16 %v229_v36, %v228_v58  ;;  %v1101_v22 = vld [vmem:[%s4986_s3 + $0x620] sm:$0xff]  ;;  %v1102_v19 = vld [vmem:[%s4986_s3 + $0x628] sm:$0xff]  ;;  %v1119_v24 = vld [vmem:[%s4986_s3 + $0x6b0] sm:$0xff]  ;;  %v1068_v58 = vmul.f32 %v3504_v54, %v1066_v50 }
  0x7b   :  { %2802 = vmatprep.subr.bf16.mxu0 %v2801_v51  ;;  %v1056_v51 = vmul.f32 %v3468_v44, %v1054_v10  ;;  %v231_v44 = vld [vmem:[%s4986_s3 + $0x2e8] sm:$0xff]  ;;  %v4191_v10 = vmax.f32 %v1097_v35, 0.0  ;;  %v216_v35 = vld [vmem:[%s4986_s3 + $0x270] sm:$0xff]  ;;  %v2854_v48 = vpack.c.bf16 %v1102_v19, %v1101_v22  ;;  %v1104_v50 = vld [vmem:[%s4986_s3 + $0x638] sm:$0xff]  ;;  %v1086_v22 = vmul.f32 %v3584_v17, %v1084_v3 }
  0x7c   :  { %2828 = vmatpush3.bf16.msra.mxu1 %v2827_v34  ;;  %v213_v34 = vld [vmem:[%s4986_s3 + $0x258] sm:$0xff]  ;;  %v2841_v5 = vpack.c.bf16 %v231_v44, %v230_v16  ;;  %v1103_v54 = vld [vmem:[%s4986_s3 + $0x630] sm:$0xff]  ;;  %v235_v16 = vld [vmem:[%s4986_s3 + $0x308] sm:$0xff] }
  0x7d   :  { %2830 = vmatprep.subr.bf16.mxu1 %v2829_v0  ;;  %v185_v0 = vld [vmem:[%s4986_s3 + $0x178] sm:$0xff]  ;;  %v2839_v1 = vpack.c.bf16 %v213_v34, %v212_v55  ;;  %v1058_v4 = vadd.f32 %v1056_v51, %v3822_v57  ;;  %v232_v57 = vld [vmem:[%s4986_s3 + $0x2f0] sm:$0xff]  ;;  %v4223_v23 = vrot.slane %v4191_v10, %v3646_v26  ;;  %v1122_v51 = vld [vmem:[%s4986_s3 + $0x6c8] sm:$0xff]  ;;  %v1074_v55 = vmul.f32 %v3523_v59, %v1072_v2 }
  0x7e   :  { %2804 = vmatpush3.bf16.msra.mxu0 %v2803_v27  ;;  %v1118_v27 = vld [vmem:[%s4986_s3 + $0x6a8] sm:$0xff]  ;;  %v2815_v7 = vpack.c.bf16 %v185_v0, %v184_v61  ;;  %v2845_v36 = vpack.c.bf16 %v233_v46, %v232_v57  ;;  %v1201_v34 = vcombine.high %v4191_v10, %v4191_v10  ;;  %v2858_v44 = vpack.c.bf16 %v1104_v50, %v1103_v54  ;;  %v1149_v59 = vld [vmem:[%s4986_s3 + $0x7a0] sm:$0xff]  ;;  %v1107_v46 = vld [vmem:[%s4986_s3 + $0x650] sm:$0xff] }
  0x7f   :  { %2806 = vmatprep.subr.bf16.mxu0 %v2805_v45  ;;  %v214_v45 = vld [vmem:[%s4986_s3 + $0x260] sm:$0xff]  ;;  %v1216_v11 = vcombine.high %v4223_v23, %v4223_v23  ;;  %v1150_v2 = vld [vmem:[%s4986_s3 + $0x7a8] sm:$0xff]  ;;  %v2860_v10 = vpack.c.bf16 %v1122_v51, %v1121_v42  ;;  %v1135_v17 = vld [vmem:[%s4986_s3 + $0x730] sm:$0xff] }
  0x80   :  { %2832 = vmatpush3.bf16.msra.mxu1 %v2831_v37  ;;  %v2852_v37 = vpack.c.bf16 %v1118_v27, %v1117_v33  ;;  %v1106_v61 = vld [vmem:[%s4986_s3 + $0x648] sm:$0xff]  ;;  %v1080_v27 = vmul.f32 %v3562_v12, %v1078_v43  ;;  %v1151_v12 = vld [vmem:[%s4986_s3 + $0x7b0] sm:$0xff]  ;;  %v1152_v43 = vld [vmem:[%s4986_s3 + $0x7b8] sm:$0xff] }
  0x81   :  { %2834 = vmatprep.subr.bf16.mxu1 %v2833_v30  ;;  %v2843_v30 = vpack.c.bf16 %v215_v6, %v214_v45  ;;  %v1134_v45 = vld [vmem:[%s4986_s3 + $0x728] sm:$0xff]  ;;  %v1125_v19 = vld [vmem:[%s4986_s3 + $0x6e0] sm:$0xff]  ;;  %v1136_v3 = vld [vmem:[%s4986_s3 + $0x738] sm:$0xff] }
  0x82   :  { %2808 = vmatpush3.bf16.msra.mxu0 %v2807_v32  ;;  %v1064_v32 = vadd.f32 %v1062_v29, %v1058_v4  ;;  %v4296_v4 = vrot.slane %v1201_v34, %v3646_v26  ;;  %v2884_v29 = vpack.c.bf16 %v1150_v2, %v1149_v59  ;;  %v1127_v54 = vld [vmem:[%s4986_s3 + $0x6f0] sm:$0xff]  ;;  %v1128_v50 = vld [vmem:[%s4986_s3 + $0x6f8] sm:$0xff]  ;;  %v1138_v34 = vld [vmem:[%s4986_s3 + $0x748] sm:$0xff] }
  0x83   :  { %2810 = vmatprep.subr.bf16.mxu0 %v2809_v60  ;;  %v217_v60 = vld [vmem:[%s4986_s3 + $0x278] sm:$0xff]  ;;  %v1111_v59 = vld [vmem:[%s4986_s3 + $0x670] sm:$0xff] }
  0x84   :  { %2836 = vmatpush3.bf16.msra.mxu1 %v2835_v49  ;;  %v2856_v49 = vpack.c.bf16 %v1120_v31, %v1119_v24  ;;  %v2847_v21 = vpack.c.bf16 %v217_v60, %v216_v35  ;;  %v1217_v31 = vcombine.high %v4296_v4, %v4296_v4  ;;  %v1154_v35 = vld [vmem:[%s4986_s3 + $0x7c8] sm:$0xff]  ;;  %v4360_v42 = vld [vmem:[%s4983_s0 + $0x78] sm:$0x3f] }
  0x85   :  { %2838 = vmatprep.subr.bf16.mxu1 %v2837_v28  ;;  %v1070_v28 = vadd.f32 %v1068_v58, %v1064_v32  ;;  %v2888_v32 = vpack.c.bf16 %v1152_v43, %v1151_v12  ;;  %v1092_v51 = vmul.f32 %v4360_v42, %v1090_v18  ;;  %v1156_v18 = vld [vmem:[%s4986_s3 + $0x7d8] sm:$0xff]  ;;  %v1131_v43 = vld [vmem:[%s4986_s3 + $0x710] sm:$0xff] }
  0x86   :  { %2812 = vmatpush3.bf16.msra.mxu0 %v2811_v38  ;;  %v234_v38 = vld [vmem:[%s4986_s3 + $0x300] sm:$0xff]  ;;  %v1112_v2 = vld [vmem:[%s4986_s3 + $0x678] sm:$0xff] }
  0x87   :  { %2814 = vmatprep.subr.bf16.mxu0 %v2813_v47  ;;  %v1105_v47 = vld [vmem:[%s4986_s3 + $0x640] sm:$0xff]  ;;  %v2850_v0 = vpack.c.bf16 %v235_v16, %v234_v38  ;;  %v1076_v33 = vadd.f32 %v1074_v55, %v1070_v28  ;;  %v1155_v16 = vld [vmem:[%s4986_s3 + $0x7d0] sm:$0xff] }
  0x88   :  { %2840 = vmatpush3.bf16.msra.mxu1 %v2839_v1  ;;  %v1123_v1 = vld [vmem:[%s4986_s3 + $0x6d0] sm:$0xff]  ;;  %v2862_v6 = vpack.c.bf16 %v1106_v61, %v1105_v47  ;;  %v1137_v55 = vld [vmem:[%s4986_s3 + $0x740] sm:$0xff]  ;;  %v1130_v47 = vld [vmem:[%s4986_s3 + $0x708] sm:$0xff] }
  0x89   :  { %2842 = vmatprep.subr.bf16.mxu1 %v2841_v5  ;;  %v1133_v5 = vld [vmem:[%s4986_s3 + $0x720] sm:$0xff]  ;;  %v1082_v24 = vadd.f32 %v1080_v27, %v1076_v33  ;;  %v2874_v33 = vpack.c.bf16 %v1112_v2, %v1111_v59  ;;  %v1163_v2 = vld [vmem:[%s4986_s3 + $0x810] sm:$0xff] }
  0x8a   :  { %2816 = vmatpush3.bf16.msra.mxu0 %v2815_v7  ;;  %v1157_v27 = vld [vmem:[%s4986_s3 + $0x7e0] sm:$0xff] }
  0x8b   :  { %2853 = vmatprep.subr.bf16.mxu0 %v2852_v37  ;;  %v1108_v37 = vld [vmem:[%s4986_s3 + $0x658] sm:$0xff] }
  0x8c   :  { %2844 = vmatpush3.bf16.msra.mxu1 %v2843_v30  ;;  %v1126_v30 = vld [vmem:[%s4986_s3 + $0x6e8] sm:$0xff]  ;;  %v2866_v58 = vpack.c.bf16 %v1108_v37, %v1107_v46  ;;  %v1141_v37 = vld [vmem:[%s4986_s3 + $0x760] sm:$0xff] }
  0x8d   :  { %896 = vmatmul.mubr.f32.vlgmr.msra.gmra.mrb[4].mxu0 %v3950_v41  ;;  %2846 = vmatprep.subr.bf16.mxu1 %v2845_v36  ;;  %v737_v41 = vcombine.high %v3970_v62, %v3970_v62  ;;  %v1124_v62 = vld [vmem:[%s4986_s3 + $0x6d8] sm:$0xff]  ;;  %v1153_v36 = vld [vmem:[%s4986_s3 + $0x7c0] sm:$0xff]  ;;  %v2868_v60 = vpack.c.bf16 %v1126_v30, %v1125_v19  ;;  %v1159_v19 = vld [vmem:[%s4986_s3 + $0x7f0] sm:$0xff] }
  0x8e   :  { %2855 = vmatpush3.bf16.msra.mxu0 %v2854_v48  ;;  %1306 = vmatprep.mubr.f32.mxu0 %v1216_v11  ;;  %v2864_v57 = vpack.c.bf16 %v1124_v62, %v1123_v1  ;;  %v1109_v48 = vld [vmem:[%s4986_s3 + $0x660] sm:$0xff]  ;;  %v1110_v11 = vld [vmem:[%s4986_s3 + $0x668] sm:$0xff]  ;;  %v2892_v28 = vpack.c.bf16 %v1154_v35, %v1153_v36  ;;  %v1139_v1 = vld [vmem:[%s4986_s3 + $0x750] sm:$0xff] }
  0x8f   :  { %2857 = vmatprep.subr.bf16.mxu0 %v2856_v49  ;;  %v751_v7 = vrot.slane %v737_v41, %v3646_v26  ;;  %v2890_v49 = vpack.c.bf16 %v1136_v3, %v1135_v17  ;;  %v2870_v38 = vpack.c.bf16 %v1110_v11, %v1109_v48  ;;  %v2894_v41 = vpack.c.bf16 %v1138_v34, %v1137_v55  ;;  %v1140_v62 = vld [vmem:[%s4986_s3 + $0x758] sm:$0xff]  ;;  %v1181_v3 = vld [vmem:[%s4986_s3 + $0x8a0] sm:$0xff]  ;;  %v1143_v35 = vld [vmem:[%s4986_s3 + $0x770] sm:$0xff] }
  0x90   :  { %2848 = vmatpush3.bf16.msra.mxu1 %v2847_v21  ;;  %v1088_v21 = vadd.f32 %v1086_v22, %v1082_v24  ;;  %v2898_v12 = vpack.c.bf16 %v1140_v62, %v1139_v1  ;;  %v1142_v22 = vld [vmem:[%s4986_s3 + $0x768] sm:$0xff]  ;;  %v1115_v24 = vld [vmem:[%s4986_s3 + $0x690] sm:$0xff]  ;;  %v1161_v11 = vld [vmem:[%s4986_s3 + $0x800] sm:$0xff] }
  0x91   :  { %2849 = vmatprep.subr.bf16.mxu1 %v3122_v56  ;;  %v1183_v55 = vld [vmem:[%s4986_s3 + $0x8b0] sm:$0xff]  ;;  %v1184_v34 = vld [vmem:[%s4986_s3 + $0x8b8] sm:$0xff]  ;;  %v1185_v62 = vld [vmem:[%s4986_s3 + $0x8c0] sm:$0xff] }
  0x92   :  { %2859 = vmatpush3.bf16.msra.mxu0 %v2858_v44  ;;  %v2872_v44 = vpack.c.bf16 %v1128_v50, %v1127_v54  ;;  %v1094_v61 = vadd.f32 %v1092_v51, %v1088_v21  ;;  %v1165_v21 = vld [vmem:[%s4986_s3 + $0x820] sm:$0xff]  ;;  %v1166_v51 = vld [vmem:[%s4986_s3 + $0x828] sm:$0xff] }
  0x93   :  { %966 = vmatmul.mubr.f32.vlgmr.msra.gmra.mrb[6].mxu1 %v4007_v25  ;;  %2861 = vmatprep.subr.bf16.mxu0 %v2860_v10  ;;  %v2886_v25 = vpack.c.bf16 %v1134_v45, %v1133_v5  ;;  %v1129_v10 = vld [vmem:[%s4986_s3 + $0x700] sm:$0xff]  ;;  %v2918_v59 = vpack.c.bf16 %v1166_v51, %v1165_v21  ;;  %v1583_v21 = vld [vmem:[%s4986_s3 + $0x930] sm:$0xff]  ;;  %v1584_v51 = vld [vmem:[%s4986_s3 + $0x938] sm:$0xff] }
  0x94   :  { %2851 = vmatpush3.bf16.msra.mxu1 %v2850_v0  ;;  %2628 = vmatprep.mubr.msk.f32.mxu1 %vm3123_vm0, %v3124_v63  ;;  %v2896_v0 = vpack.c.bf16 %v1156_v18, %v1155_v16  ;;  %v2876_v5 = vpack.c.bf16 %v1130_v47, %v1129_v10  ;;  %v1113_v45 = vld [vmem:[%s4986_s3 + $0x680] sm:$0xff]  ;;  %v1146_v18 = vld [vmem:[%s4986_s3 + $0x788] sm:$0xff]  ;;  %v2920_v47 = vpack.c.bf16 %v1184_v34, %v1183_v55 }
  0x95   :  { %2885 = vmatprep.subr.bf16.mxu1 %v2884_v29  ;;  %v1158_v29 = vld [vmem:[%s4986_s3 + $0x7e8] sm:$0xff]  ;;  %v1145_v16 = vld [vmem:[%s4986_s3 + $0x780] sm:$0xff] }
  0x96   :  { %2863 = vmatpush3.bf16.msra.mxu0 %v2862_v6  ;;  %v1114_v6 = vld [vmem:[%s4986_s3 + $0x688] sm:$0xff]  ;;  %v2900_v46 = vpack.c.bf16 %v1158_v29, %v1157_v27  ;;  %v2910_v1 = vpack.c.bf16 %v1146_v18, %v1145_v16  ;;  %v1601_v55 = vld [vmem:[%s4986_s3 + $0x9c0] sm:$0xff] }
  0x97   :  { %2629 = vmatmul.mubr.msk.f32.vlgmr.msra.gmra.mrb[8].mxu1 %vm435_vm1, %v751_v7  ;;  %2865 = vmatprep.subr.bf16.mxu0 %v2864_v57  ;;  %v1132_v7 = vld [vmem:[%s4986_s3 + $0x718] sm:$0xff]  ;;  %v1098_v57 = vadd.f32 %v1096_v53, %v1094_v61  ;;  %v1167_v61 = vld [vmem:[%s4986_s3 + $0x830] sm:$0xff]  ;;  %v3061_v29 = vld [vmem:[%s4983_s0 + $0x24] sm:$0x3f] }
  0x98   :  { %2887 = vmatpush3.bf16.msra.mxu1 %v2886_v25  ;;  %1376 = vmatprep.mubr.f32.mxu1 %v1217_v31  ;;  %v2878_v25 = vpack.c.bf16 %v1114_v6, %v1113_v45  ;;  %v1160_v53 = vld [vmem:[%s4986_s3 + $0x7f8] sm:$0xff]  ;;  %v2880_v30 = vpack.c.bf16 %v1132_v7, %v1131_v43  ;;  %v1147_v6 = vld [vmem:[%s4986_s3 + $0x790] sm:$0xff]  ;;  %v1173_v16 = vld [vmem:[%s4986_s3 + $0x860] sm:$0xff] }
  0x99   :  { %2889 = vmatprep.subr.bf16.mxu1 %v2888_v32  ;;  %v1116_v31 = vld [vmem:[%s4986_s3 + $0x698] sm:$0xff]  ;;  %v2902_v32 = vpack.c.bf16 %v1142_v22, %v1141_v37  ;;  %v4435_v17 = vmax.f32 %v1098_v57, 0.0  ;;  %v2904_v36 = vpack.c.bf16 %v1160_v53, %v1159_v19  ;;  %v1187_v57 = vld [vmem:[%s4986_s3 + $0x8d0] sm:$0xff]  ;;  %v1197_v53 = vld [vmem:[%s4986_s3 + $0x920] sm:$0xff] }
  0x9a   :  { %2867 = vmatpush3.bf16.msra.mxu0 %v2866_v58  ;;  %v1182_v58 = vld [vmem:[%s4986_s3 + $0x8a8] sm:$0xff]  ;;  %v2882_v48 = vpack.c.bf16 %v1116_v31, %v1115_v24 }
  0x9b   :  { %2869 = vmatprep.subr.bf16.mxu0 %v2868_v60  ;;  %v1144_v60 = vld [vmem:[%s4986_s3 + $0x778] sm:$0xff]  ;;  %v4457_v54 = vrot.slane %v4435_v17, %v3646_v26  ;;  %v2916_v50 = vpack.c.bf16 %v1182_v58, %v1181_v3  ;;  %v1218_v31 = vcombine.high %v4435_v17, %v4435_v17  ;;  %v1171_v3 = vld [vmem:[%s4986_s3 + $0x850] sm:$0xff]  ;;  %v1190_v17 = vld [vmem:[%s4986_s3 + $0x8e8] sm:$0xff] }
  0x9c   :  { %2891 = vmatpush3.bf16.msra.mxu1 %v2890_v49  ;;  %v1162_v49 = vld [vmem:[%s4986_s3 + $0x808] sm:$0xff]  ;;  %v1172_v58 = vld [vmem:[%s4986_s3 + $0x858] sm:$0xff] }
  0x9d   :  { %2893 = vmatprep.subr.bf16.mxu1 %v2892_v28  ;;  %v2906_v28 = vpack.c.bf16 %v1144_v60, %v1143_v35  ;;  %v1233_v10 = vcombine.high %v4457_v54, %v4457_v54  ;;  %v1189_v35 = vld [vmem:[%s4986_s3 + $0x8e0] sm:$0xff]  ;;  %v1232_v34 = vrot.slane %v1218_v31, %v3646_v26  ;;  %v1174_v18 = vld [vmem:[%s4986_s3 + $0x868] sm:$0xff] }
  0x9e   :  { %2871 = vmatpush3.bf16.msra.mxu0 %v2870_v38  ;;  %v2908_v38 = vpack.c.bf16 %v1162_v49, %v1161_v11  ;;  %v3063_v11 = vld [vmem:[%s4983_s0 + $0x40] sm:$0x3f] }
  0x9f   :  { %2873 = vmatprep.subr.bf16.mxu0 %v2872_v44  ;;  %v1578_v44 = vstv %s4421_s25  ;;  %v1550_v49 = vmul.f32 %v3063_v11, %v1548_v8  ;;  %v1602_v8 = vld [vmem:[%s4986_s3 + $0x9c8] sm:$0xff] }
  0xa0   :  { %2895 = vmatpush3.bf16.msra.mxu1 %v2894_v41  ;;  %v1164_v41 = vld [vmem:[%s4986_s3 + $0x818] sm:$0xff]  ;;  %v1579_v27 = vadd.f32 %v1578_v44, %v4147_v20 }
  0xa1   :  { %2897 = vmatprep.subr.bf16.mxu1 %v2896_v0  ;;  %v1168_v0 = vld [vmem:[%s4986_s3 + $0x838] sm:$0xff]  ;;  %v2912_v45 = vpack.c.bf16 %v1164_v41, %v1163_v2  ;;  %v1191_v41 = vld [vmem:[%s4986_s3 + $0x8f0] sm:$0xff] }
  0xa2   :  { %2875 = vmatpush3.bf16.msra.mxu0 %v2874_v33  ;;  %v1186_v33 = vld [vmem:[%s4986_s3 + $0x8c8] sm:$0xff]  ;;  %v2922_v20 = vpack.c.bf16 %v1168_v0, %v1167_v61  ;;  %v4525_v37 = vmax.f32 %v1579_v27, 0.0  ;;  %v2955_v0 = vpack.c.bf16 %v1602_v8, %v1601_v55  ;;  %v1604_v27 = vld [vmem:[%s4986_s3 + $0x9d8] sm:$0xff]  ;;  %v1574_v8 = vmul.f32 %v4360_v42, %v1572_v39 }
  0xa3   :  { %2877 = vmatprep.subr.bf16.mxu0 %v2876_v5  ;;  %v1538_v5 = vmul.f32 %v3061_v29, %v1536_v14  ;;  %v2924_v43 = vpack.c.bf16 %v1186_v33, %v1185_v62  ;;  %v1169_v14 = vld [vmem:[%s4986_s3 + $0x840] sm:$0xff]  ;;  %v2934_v62 = vpack.c.bf16 %v1174_v18, %v1173_v16  ;;  %v1603_v33 = vld [vmem:[%s4986_s3 + $0x9d0] sm:$0xff]  ;;  %v1592_v16 = vld [vmem:[%s4986_s3 + $0x978] sm:$0xff] }
  0xa4   :  { %2899 = vmatpush3.bf16.msra.mxu1 %v2898_v12  ;;  %v1148_v12 = vld [vmem:[%s4986_s3 + $0x798] sm:$0xff]  ;;  %v4561_v60 = vrot.slane %v4525_v37, %v3646_v26  ;;  %v1683_v11 = vcombine.high %v4525_v37, %v4525_v37  ;;  %v1610_v39 = vld [vmem:[%s4986_s3 + $0xa08] sm:$0xff] }
  0xa5   :  { %2901 = vmatprep.subr.bf16.mxu1 %v2900_v46  ;;  %v2914_v7 = vpack.c.bf16 %v1148_v12, %v1147_v6  ;;  %v1188_v46 = vld [vmem:[%s4986_s3 + $0x8d8] sm:$0xff]  ;;  %v1540_v22 = vadd.f32 %v1538_v5, %v4066_v15  ;;  %v1599_v15 = vld [vmem:[%s4986_s3 + $0x9b0] sm:$0xff]  ;;  %v1193_v12 = vld [vmem:[%s4986_s3 + $0x900] sm:$0xff] }
  0xa6   :  { %2879 = vmatpush3.bf16.msra.mxu0 %v2878_v25  ;;  %v3062_v25 = vld [vmem:[%s4983_s0 + $0x32] sm:$0x3f]  ;;  %v1632_v37 = vld [vmem:[%s4986_s3 + $0xab8] sm:$0xff]  ;;  %v4705_v42 = vrot.slane %v1683_v11, %v3646_v26 }
  0xa7   :  { %2881 = vmatprep.subr.bf16.mxu0 %v2880_v30  ;;  %v1544_v19 = vmul.f32 %v3062_v25, %v1542_v40  ;;  %v1198_v30 = vld [vmem:[%s4986_s3 + $0x928] sm:$0xff]  ;;  %v1600_v40 = vld [vmem:[%s4986_s3 + $0x9b8] sm:$0xff]  ;;  %v1175_v5 = vld [vmem:[%s4986_s3 + $0x870] sm:$0xff] }
  0xa8   :  { %2903 = vmatpush3.bf16.msra.mxu1 %v2902_v32  ;;  %v2928_v32 = vpack.c.bf16 %v1188_v46, %v1187_v57  ;;  %v1587_v57 = vld [vmem:[%s4986_s3 + $0x950] sm:$0xff]  ;;  %v1588_v46 = vld [vmem:[%s4986_s3 + $0x958] sm:$0xff]  ;;  %v1605_v25 = vld [vmem:[%s4986_s3 + $0x9e0] sm:$0xff] }
  0xa9   :  { %2905 = vmatprep.subr.bf16.mxu1 %v2904_v36  ;;  %v2949_v36 = vpack.c.bf16 %v1198_v30, %v1197_v53  ;;  %v1177_v53 = vld [vmem:[%s4986_s3 + $0x880] sm:$0xff]  ;;  %v1178_v30 = vld [vmem:[%s4986_s3 + $0x888] sm:$0xff]  ;;  %v1639_v11 = vld [vmem:[%s4986_s3 + $0xaf0] sm:$0xff] }
  0xaa   :  { %2883 = vmatpush3.bf16.msra.mxu0 %v2882_v48  ;;  %v1546_v48 = vadd.f32 %v1544_v19, %v1540_v22 }
  0xab   :  { %2917 = vmatprep.subr.bf16.mxu0 %v2916_v50  ;;  %v2951_v50 = vpack.c.bf16 %v1600_v40, %v1599_v15  ;;  %v1195_v15 = vld [vmem:[%s4986_s3 + $0x910] sm:$0xff]  ;;  %v1196_v40 = vld [vmem:[%s4986_s3 + $0x918] sm:$0xff] }
  0xac   :  { %2907 = vmatpush3.bf16.msra.mxu1 %v2906_v28  ;;  %v2930_v28 = vpack.c.bf16 %v1172_v58, %v1171_v3  ;;  %v1552_v61 = vadd.f32 %v1550_v49, %v1546_v48  ;;  %v1607_v48 = vld [vmem:[%s4986_s3 + $0x9f0] sm:$0xff]  ;;  %v2944_v49 = vpack.c.bf16 %v1196_v40, %v1195_v15 }
  0xad   :  { %2909 = vmatprep.subr.bf16.mxu1 %v2908_v38  ;;  %1307 = vmatmul.mubr.f32.vlgmr.msra.gmra.mrb[6].mxu0 %v4223_v23  ;;  %v1170_v23 = vld [vmem:[%s4986_s3 + $0x848] sm:$0xff]  ;;  %v2932_v38 = vpack.c.bf16 %v1190_v17, %v1189_v35  ;;  %v2942_v17 = vpack.c.bf16 %v1178_v30, %v1177_v53  ;;  %v1637_v30 = vld [vmem:[%s4986_s3 + $0xae0] sm:$0xff] }
  0xae   :  { %2919 = vmatpush3.bf16.msra.mxu0 %v2918_v59  ;;  %1446 = vmatprep.mubr.f32.mxu0 %v1233_v10  ;;  %v2926_v24 = vpack.c.bf16 %v1170_v23, %v1169_v14  ;;  %v3064_v59 = vld [vmem:[%s4983_s0 + $0x4e] sm:$0x3f]  ;;  %v1192_v10 = vld [vmem:[%s4986_s3 + $0x8f8] sm:$0xff] }
  0xaf   :  { %2921 = vmatprep.subr.bf16.mxu0 %v2920_v47  ;;  %v1556_v2 = vmul.f32 %v3064_v59, %v1554_v9  ;;  %v1698_v47 = vcombine.high %v4561_v60, %v4561_v60  ;;  %v1585_v9 = vld [vmem:[%s4986_s3 + $0x940] sm:$0xff]  ;;  %v2936_v29 = vpack.c.bf16 %v1192_v10, %v1191_v41  ;;  %v1590_v35 = vld [vmem:[%s4986_s3 + $0x968] sm:$0xff]  ;;  %v1616_v41 = vld [vmem:[%s4986_s3 + $0xa38] sm:$0xff] }
  0xb0   :  { %2911 = vmatpush3.bf16.msra.mxu1 %v2910_v1  ;;  %v1586_v1 = vld [vmem:[%s4986_s3 + $0x948] sm:$0xff]  ;;  %v3065_v14 = vld [vmem:[%s4983_s0 + $0x5c] sm:$0x3f] }
  0xb1   :  { %2913 = vmatprep.subr.bf16.mxu1 %v2912_v45  ;;  %v1176_v45 = vld [vmem:[%s4986_s3 + $0x878] sm:$0xff]  ;;  %v2957_v6 = vpack.c.bf16 %v1586_v1, %v1585_v9  ;;  %v1562_v23 = vmul.f32 %v3065_v14, %v1560_v13  ;;  %v1606_v13 = vld [vmem:[%s4986_s3 + $0x9e8] sm:$0xff]  ;;  %v1609_v59 = vld [vmem:[%s4986_s3 + $0xa00] sm:$0xff] }
  0xb2   :  { %2923 = vmatpush3.bf16.msra.mxu0 %v2922_v20  ;;  %v1194_v20 = vld [vmem:[%s4986_s3 + $0x908] sm:$0xff]  ;;  %v2938_v22 = vpack.c.bf16 %v1176_v45, %v1175_v5  ;;  %v2963_v58 = vpack.c.bf16 %v1606_v13, %v1605_v25  ;;  %v2971_v9 = vpack.c.bf16 %v1610_v39, %v1609_v59  ;;  %v1593_v1 = vld [vmem:[%s4986_s3 + $0x980] sm:$0xff]  ;;  %v1699_v5 = vcombine.high %v4705_v42, %v4705_v42  ;;  %v1636_v14 = vld [vmem:[%s4986_s3 + $0xad8] sm:$0xff] }
  0xb3   :  { %2925 = vmatprep.subr.bf16.mxu0 %v2924_v43  ;;  %v1558_v43 = vadd.f32 %v1556_v2, %v1552_v61  ;;  %v2940_v19 = vpack.c.bf16 %v1194_v20, %v1193_v12  ;;  %v1634_v61 = vld [vmem:[%s4986_s3 + $0xac8] sm:$0xff]  ;;  %v1613_v25 = vld [vmem:[%s4986_s3 + $0xa20] sm:$0xff]  ;;  %v1619_v13 = vld [vmem:[%s4986_s3 + $0xa50] sm:$0xff] }
  0xb4   :  { %2915 = vmatpush3.bf16.msra.mxu1 %v2914_v7  ;;  %v2959_v7 = vpack.c.bf16 %v1604_v27, %v1603_v33  ;;  %v1611_v27 = vld [vmem:[%s4986_s3 + $0xa10] sm:$0xff]  ;;  %v1618_v12 = vld [vmem:[%s4986_s3 + $0xa48] sm:$0xff]  ;;  %v1641_v59 = vld [vmem:[%s4986_s3 + $0xb00] sm:$0xff] }
  0xb5   :  { %2948 = vmatprep.subr.bf16.mxu1 %v3122_v56  ;;  %v1564_v31 = vadd.f32 %v1562_v23, %v1558_v43  ;;  %v1635_v43 = vld [vmem:[%s4986_s3 + $0xad0] sm:$0xff]  ;;  %v1642_v39 = vld [vmem:[%s4986_s3 + $0xb08] sm:$0xff] }
  0xb6   :  { %2927 = vmatpush3.bf16.msra.mxu0 %v2926_v24  ;;  %v2961_v24 = vpack.c.bf16 %v1588_v46, %v1587_v57  ;;  %v1595_v57 = vld [vmem:[%s4986_s3 + $0x990] sm:$0xff]  ;;  %v1596_v46 = vld [vmem:[%s4986_s3 + $0x998] sm:$0xff] }
  0xb7   :  { %1377 = vmatmul.mubr.f32.vlgmr.msra.gmra.mrb[10].mxu1 %v4296_v4  ;;  %2929 = vmatprep.subr.bf16.mxu0 %v2928_v32  ;;  %v2953_v4 = vpack.c.bf16 %v1584_v51, %v1583_v21  ;;  %v3066_v32 = vld [vmem:[%s4983_s0 + $0x6a] sm:$0x3f]  ;;  %v1180_v21 = vld [vmem:[%s4986_s3 + $0x898] sm:$0xff]  ;;  %v2977_v53 = vpack.c.bf16 %v1596_v46, %v1595_v57  ;;  %v1645_v57 = vld [vmem:[%s4986_s3 + $0xb20] sm:$0xff] }
  0xb8   :  { %2950 = vmatpush3.bf16.msra.mxu1 %v2949_v36  ;;  %2635 = vmatprep.mubr.msk.f32.mxu1 %vm3123_vm0, %v3124_v63  ;;  %v1568_v3 = vmul.f32 %v3066_v32, %v1566_v52  ;;  %v1589_v36 = vld [vmem:[%s4986_s3 + $0x960] sm:$0xff]  ;;  %v1608_v52 = vld [vmem:[%s4986_s3 + $0x9f8] sm:$0xff]  ;;  %v1598_v32 = vld [vmem:[%s4986_s3 + $0x9a8] sm:$0xff] }
  0xb9   :  { %2952 = vmatprep.subr.bf16.mxu1 %v2951_v50  ;;  %v1179_v50 = vld [vmem:[%s4986_s3 + $0x890] sm:$0xff]  ;;  %v2965_v51 = vpack.c.bf16 %v1590_v35, %v1589_v36  ;;  %v1664_v36 = vld [vmem:[%s4986_s3 + $0xbb8] sm:$0xff]  ;;  %v1646_v46 = vld [vmem:[%s4986_s3 + $0xb28] sm:$0xff] }
  0xba   :  { %2931 = vmatpush3.bf16.msra.mxu0 %v2930_v28  ;;  %v1631_v28 = vld [vmem:[%s4986_s3 + $0xab0] sm:$0xff]  ;;  %v1570_v55 = vadd.f32 %v1568_v3, %v1564_v31  ;;  %v2946_v18 = vpack.c.bf16 %v1180_v21, %v1179_v50  ;;  %v1597_v31 = vld [vmem:[%s4986_s3 + $0x9a0] sm:$0xff] }
  0xbb   :  { %2636 = vmatmul.mubr.msk.f32.vlgmr.msra.gmra.mrb[12].mxu1 %vm435_vm1, %v1232_v34  ;;  %2933 = vmatprep.subr.bf16.mxu0 %v2932_v38  ;;  %v2967_v34 = vpack.c.bf16 %v1608_v52, %v1607_v48  ;;  %v1591_v38 = vld [vmem:[%s4986_s3 + $0x970] sm:$0xff]  ;;  %v2983_v2 = vpack.c.bf16 %v1632_v37, %v1631_v28  ;;  %v1622_v48 = vld [vmem:[%s4986_s3 + $0xa68] sm:$0xff]  ;;  %v2981_v52 = vpack.c.bf16 %v1598_v32, %v1597_v31  ;;  %v1648_v28 = vld [vmem:[%s4986_s3 + $0xb38] sm:$0xff] }
  0xbc   :  { %2954 = vmatpush3.bf16.msra.mxu1 %v2953_v4  ;;  %1788 = vmatprep.mubr.f32.mxu1 %v1698_v47  ;;  %v1615_v4 = vld [vmem:[%s4986_s3 + $0xa30] sm:$0xff]  ;;  %v2969_v10 = vpack.c.bf16 %v1592_v16, %v1591_v38  ;;  %v1633_v47 = vld [vmem:[%s4986_s3 + $0xac0] sm:$0xff]  ;;  %v1624_v16 = vld [vmem:[%s4986_s3 + $0xa78] sm:$0xff] }
  0xbd   :  { %2956 = vmatprep.subr.bf16.mxu1 %v2955_v0  ;;  %v1576_v0 = vadd.f32 %v1574_v8, %v1570_v55  ;;  %v2985_v33 = vpack.c.bf16 %v1616_v41, %v1615_v4  ;;  %v2987_v45 = vpack.c.bf16 %v1634_v61, %v1633_v47  ;;  %v1665_v55 = vld [vmem:[%s4986_s3 + $0xbc0] sm:$0xff]  ;;  %v1666_v8 = vld [vmem:[%s4986_s3 + $0xbc8] sm:$0xff]  ;;  %v1623_v38 = vld [vmem:[%s4986_s3 + $0xa70] sm:$0xff] }
  0xbe   :  { %2935 = vmatpush3.bf16.msra.mxu0 %v2934_v62  ;;  %v1594_v62 = vld [vmem:[%s4986_s3 + $0x988] sm:$0xff]  ;;  %v3019_v4 = vpack.c.bf16 %v1666_v8, %v1665_v55  ;;  %v1649_v41 = vld [vmem:[%s4986_s3 + $0xb40] sm:$0xff]  ;;  %v3001_v47 = vpack.c.bf16 %v1624_v16, %v1623_v38  ;;  %v1667_v61 = vld [vmem:[%s4986_s3 + $0xbd0] sm:$0xff] }
  0xbf   :  { %2937 = vmatprep.subr.bf16.mxu0 %v2936_v29  ;;  %v1612_v29 = vld [vmem:[%s4986_s3 + $0xa18] sm:$0xff]  ;;  %v2973_v20 = vpack.c.bf16 %v1594_v62, %v1593_v1  ;;  %v1580_v23 = vadd.f32 %v1578_v44, %v1576_v0  ;;  %v2991_v44 = vpack.c.bf16 %v1636_v14, %v1635_v43  ;;  %v1625_v1 = vld [vmem:[%s4986_s3 + $0xa80] sm:$0xff]  ;;  %v1626_v62 = vld [vmem:[%s4986_s3 + $0xa88] sm:$0xff] }
  0xc0   :  { %2958 = vmatpush3.bf16.msra.mxu1 %v2957_v6  ;;  %v1617_v6 = vld [vmem:[%s4986_s3 + $0xa40] sm:$0xff]  ;;  %v1668_v0 = vld [vmem:[%s4986_s3 + $0xbd8] sm:$0xff]  ;;  %v1627_v14 = vld [vmem:[%s4986_s3 + $0xa90] sm:$0xff] }
  0xc1   :  { %2960 = vmatprep.subr.bf16.mxu1 %v2959_v7  ;;  %v2975_v7 = vpack.c.bf16 %v1612_v29, %v1611_v27  ;;  %v4772_v15 = vmax.f32 %v1580_v23, 0.0  ;;  %v1643_v27 = vld [vmem:[%s4986_s3 + $0xb10] sm:$0xff]  ;;  %v3023_v29 = vpack.c.bf16 %v1668_v0, %v1667_v61  ;;  %v1628_v23 = vld [vmem:[%s4986_s3 + $0xa98] sm:$0xff] }
  0xc2   :  { %2939 = vmatpush3.bf16.msra.mxu0 %v2938_v22  ;;  %v2989_v22 = vpack.c.bf16 %v1618_v12, %v1617_v6  ;;  %v3005_v6 = vpack.c.bf16 %v1626_v62, %v1625_v1  ;;  %v1669_v12 = vld [vmem:[%s4986_s3 + $0xbe0] sm:$0xff]  ;;  %v1655_v32 = vld [vmem:[%s4986_s3 + $0xb70] sm:$0xff]  ;;  %v1660_v38 = vld [vmem:[%s4986_s3 + $0xb98] sm:$0xff] }
  0xc3   :  { %2941 = vmatprep.subr.bf16.mxu0 %v2940_v19  ;;  %v1620_v19 = vld [vmem:[%s4986_s3 + $0xa58] sm:$0xff]  ;;  %v4800_v50 = vrot.slane %v4772_v15, %v3646_v26 }
  0xc4   :  { %2962 = vmatpush3.bf16.msra.mxu1 %v2961_v24  ;;  %v1638_v24 = vld [vmem:[%s4986_s3 + $0xae8] sm:$0xff]  ;;  %v2993_v3 = vpack.c.bf16 %v1620_v19, %v1619_v13  ;;  %v1671_v13 = vld [vmem:[%s4986_s3 + $0xbf0] sm:$0xff]  ;;  %v1672_v19 = vld [vmem:[%s4986_s3 + $0xbf8] sm:$0xff] }
  0xc5   :  { %2964 = vmatprep.subr.bf16.mxu1 %v2963_v58  ;;  %v1663_v58 = vld [vmem:[%s4986_s3 + $0xbb0] sm:$0xff]  ;;  %v2995_v35 = vpack.c.bf16 %v1638_v24, %v1637_v30  ;;  %v1629_v30 = vld [vmem:[%s4986_s3 + $0xaa0] sm:$0xff]  ;;  %v1630_v24 = vld [vmem:[%s4986_s3 + $0xaa8] sm:$0xff]  ;;  %v3031_v31 = vpack.c.bf16 %v1672_v19, %v1671_v13 }
  0xc6   :  { %2943 = vmatpush3.bf16.msra.mxu0 %v2942_v17  ;;  %v1621_v17 = vld [vmem:[%s4986_s3 + $0xa60] sm:$0xff]  ;;  %v3015_v21 = vpack.c.bf16 %v1664_v36, %v1663_v58  ;;  %v3013_v58 = vpack.c.bf16 %v1630_v24, %v1629_v30 }
  0xc7   :  { %2945 = vmatprep.subr.bf16.mxu0 %v2944_v49  ;;  %v1640_v49 = vld [vmem:[%s4986_s3 + $0xaf8] sm:$0xff]  ;;  %v2997_v37 = vpack.c.bf16 %v1622_v48, %v1621_v17  ;;  %v1673_v36 = vld [vmem:[%s4986_s3 + $0xc00] sm:$0xff]  ;;  %v1679_v17 = vld [vmem:[%s4986_s3 + $0xc30] sm:$0xff] }
  0xc8   :  { %2966 = vmatpush3.bf16.msra.mxu1 %v2965_v51  ;;  %v1647_v51 = vld [vmem:[%s4986_s3 + $0xb30] sm:$0xff]  ;;  %v1680_v48 = vld [vmem:[%s4986_s3 + $0xc38] sm:$0xff] }
  0xc9   :  { %2968 = vmatprep.subr.bf16.mxu1 %v2967_v34  ;;  %v2999_v34 = vpack.c.bf16 %v1640_v49, %v1639_v11  ;;  %v1657_v49 = vld [vmem:[%s4986_s3 + $0xb80] sm:$0xff]  ;;  %v3048_v55 = vpack.c.bf16 %v1680_v48, %v1679_v17 }
  0xca   :  { %2947 = vmatpush3.bf16.msra.mxu0 %v2946_v18  ;;  %v3017_v18 = vpack.c.bf16 %v1648_v28, %v1647_v51  ;;  %v1700_v51 = vcombine.high %v4772_v15, %v4772_v15  ;;  %v1675_v28 = vld [vmem:[%s4986_s3 + $0xc10] sm:$0xff] }
  0xcb   :  { %2984 = vmatprep.subr.bf16.mxu0 %v2983_v2  ;;  %v1715_v2 = vcombine.high %v4800_v50, %v4800_v50  ;;  %v1659_v15 = vld [vmem:[%s4986_s3 + $0xb90] sm:$0xff] }
  0xcc   :  { %2970 = vmatpush3.bf16.msra.mxu1 %v2969_v10  ;;  %v1650_v10 = vld [vmem:[%s4986_s3 + $0xb48] sm:$0xff]  ;;  %v1714_v16 = vrot.slane %v1700_v51, %v3646_v26  ;;  %v1661_v26 = vld [vmem:[%s4986_s3 + $0xba0] sm:$0xff] }
  0xcd   :  { %1447 = vmatmul.mubr.f32.vlgmr.msra.gmra.mrb[8].mxu0 %v4457_v54  ;;  %2972 = vmatprep.subr.bf16.mxu1 %v2971_v9  ;;  %v1614_v54 = vld [vmem:[%s4986_s3 + $0xa28] sm:$0xff]  ;;  %v3003_v9 = vpack.c.bf16 %v1642_v39, %v1641_v59  ;;  %v3041_v59 = vpack.c.bf16 %v1660_v38, %v1659_v15 }
  0xce   :  { %2986 = vmatpush3.bf16.msra.mxu0 %v2985_v33  ;;  %1858 = vmatprep.mubr.f32.mxu0 %v1699_v5  ;;  %v2979_v40 = vpack.c.bf16 %v1614_v54, %v1613_v25  ;;  %v3021_v33 = vpack.c.bf16 %v1650_v10, %v1649_v41  ;;  %v1651_v5 = vld [vmem:[%s4986_s3 + $0xb50] sm:$0xff]  ;;  %v1653_v25 = vld [vmem:[%s4986_s3 + $0xb60] sm:$0xff]  ;;  %v1654_v54 = vld [vmem:[%s4986_s3 + $0xb68] sm:$0xff] }
  0xcf   :  { %2988 = vmatprep.subr.bf16.mxu0 %v2987_v45  ;;  %v1652_v45 = vld [vmem:[%s4986_s3 + $0xb58] sm:$0xff] }
  0xd0   :  { %2974 = vmatpush3.bf16.msra.mxu1 %v2973_v20  ;;  %v1670_v20 = vld [vmem:[%s4986_s3 + $0xbe8] sm:$0xff] }
  0xd1   :  { %2976 = vmatprep.subr.bf16.mxu1 %v2975_v7  ;;  %v3025_v7 = vpack.c.bf16 %v1652_v45, %v1651_v5 }
  0xd2   :  { %2990 = vmatpush3.bf16.msra.mxu0 %v2989_v22  ;;  %v3027_v22 = vpack.c.bf16 %v1670_v20, %v1669_v12 }
  0xd3   :  { %2992 = vmatprep.subr.bf16.mxu0 %v2991_v44  ;;  %v3009_v44 = vpack.c.bf16 %v1628_v23, %v1627_v14  ;;  %v2015_v23 = vld [vmem:[%s4988_s5 + $0x10] sm:$0xf] }
  0xd4   :  { %2978 = vmatpush3.bf16.msra.mxu1 %v2977_v53  ;;  %v3011_v53 = vpack.c.bf16 %v1646_v46, %v1645_v57 }
  0xd5   :  { %2980 = vmatprep.subr.bf16.mxu1 %v2979_v40  ;;  %v3029_v40 = vpack.c.bf16 %v1654_v54, %v1653_v25 }
  0xd6   :  { %2994 = vmatpush3.bf16.msra.mxu0 %v2993_v3  ;;  %v1656_v3 = vld [vmem:[%s4986_s3 + $0xb78] sm:$0xff] }
  0xd7   :  { %2996 = vmatprep.subr.bf16.mxu0 %v2995_v35  ;;  %v1674_v35 = vld [vmem:[%s4986_s3 + $0xc08] sm:$0xff] }
  0xd8   :  { %2982 = vmatpush3.bf16.msra.mxu1 %v2981_v52  ;;  %v3033_v52 = vpack.c.bf16 %v1656_v3, %v1655_v32  ;;  %v3035_v11 = vpack.c.bf16 %v1674_v35, %v1673_v36 }
  0xd9   :  { %3016 = vmatprep.subr.bf16.mxu1 %v3015_v21  ;;  %v1658_v21 = vld [vmem:[%s4986_s3 + $0xb88] sm:$0xff] }
  0xda   :  { %2998 = vmatpush3.bf16.msra.mxu0 %v2997_v37  ;;  %v1676_v37 = vld [vmem:[%s4986_s3 + $0xc18] sm:$0xff]  ;;  %v3037_v8 = vpack.c.bf16 %v1658_v21, %v1657_v49 }
  0xdb   :  { %1789 = vmatmul.mubr.f32.vlgmr.msra.gmra.mrb[14].mxu1 %v4561_v60  ;;  %3000 = vmatprep.subr.bf16.mxu0 %v2999_v34  ;;  %v1644_v60 = vld [vmem:[%s4986_s3 + $0xb18] sm:$0xff]  ;;  %v3039_v34 = vpack.c.bf16 %v1676_v37, %v1675_v28 }
  0xdc   :  { %3018 = vmatpush3.bf16.msra.mxu1 %v3017_v18  ;;  %1928 = vmatprep.mubr.f32.mxu1 %v1715_v2  ;;  %v3007_v43 = vpack.c.bf16 %v1644_v60, %v1643_v27  ;;  %v1677_v18 = vld [vmem:[%s4986_s3 + $0xc20] sm:$0xff]  ;;  %v1662_v2 = vld [vmem:[%s4986_s3 + $0xba8] sm:$0xff] }
  0xdd   :  { %3020 = vmatprep.subr.bf16.mxu1 %v3019_v4  ;;  %v3045_v4 = vpack.c.bf16 %v1662_v2, %v1661_v26  ;;  %v2177_v2 = vld [vmem:[%s4987_s4] ss:$0 sm:$0xff] }
  0xde   :  { %3002 = vmatpush3.bf16.msra.mxu0 %v3001_v47 }
  0xdf   :  { %3004 = vmatprep.subr.bf16.mxu0 %v3003_v9 }
  0xe0   :  { %3022 = vmatpush3.bf16.msra.mxu1 %v3021_v33 }
  0xe1   :  { %3024 = vmatprep.subr.bf16.mxu1 %v3023_v29 }
  0xe2   :  { %3006 = vmatpush3.bf16.msra.mxu0 %v3005_v6 }
  0xe3   :  { %3008 = vmatprep.subr.bf16.mxu0 %v3007_v43  ;;  %v2014_v43 = vld [vmem:[%s4988_s5 + $0x8] sm:$0xff] }
  0xe4   :  { %3026 = vmatpush3.bf16.msra.mxu1 %v3025_v7 }
  0xe5   :  { %3028 = vmatprep.subr.bf16.mxu1 %v3027_v22 }
  0xe6   :  { %3010 = vmatpush3.bf16.msra.mxu0 %v3009_v44 }
  0xe7   :  { %3012 = vmatprep.subr.bf16.mxu0 %v3011_v53 }
  0xe8   :  { %3030 = vmatpush3.bf16.msra.mxu1 %v3029_v40 }
  0xe9   :  { %3032 = vmatprep.subr.bf16.mxu1 %v3031_v31 }
  0xea   :  { %3014 = vmatpush3.bf16.msra.mxu0 %v3013_v58 }
  0xeb   :  { %3047 = vmatprep.subr.bf16.mxu0 %v3122_v56 }
  0xec   :  { %3034 = vmatpush3.bf16.msra.mxu1 %v3033_v52 }
  0xed   :  { %1859 = vmatmul.mubr.f32.vlgmr.msra.gmra.mrb[10].mxu0 %v4705_v42  ;;  %3036 = vmatprep.subr.bf16.mxu1 %v3035_v11  ;;  %v1678_v42 = vld [vmem:[%s4986_s3 + $0xc28] sm:$0xff] }
  0xee   :  { %3049 = vmatpush3.bf16.msra.mxu0 %v3048_v55  ;;  %2642 = vmatprep.mubr.msk.f32.mxu0 %vm3123_vm0, %v3124_v63  ;;  %v3043_v39 = vpack.c.bf16 %v1678_v42, %v1677_v18 }
  0xef   :  { %3050 = vmatprep.subr.bf16.mxu0 %v3122_v56 }
  0xf0   :  { %3038 = vmatpush3.bf16.msra.mxu1 %v3037_v8 }
  0xf1   :  { %3040 = vmatprep.subr.bf16.mxu1 %v3039_v34  ;;  %2643 = vmatmul.mubr.msk.f32.vlgmr.msra.gmra.mrb[12].mxu0 %vm435_vm1, %v1714_v16 }
  0xf2   :  { %2651 = vmatprep.mubr.msk.f32.mxu0 %vm3123_vm0, %v3124_v63 }
  0xf4   :  { %3042 = vmatpush3.bf16.msra.mxu1 %v3041_v59 }
  0xf5   :  { %3044 = vmatprep.subr.bf16.mxu1 %v3043_v39 }
  0xf8   :  { %3046 = vmatpush3.bf16.msra.mxu1 %v3045_v4 }
  0xfb   :  { %1929 = vmatmul.mubr.f32.vlgmr.msra.gmra.mrb[16].mxu1 %v4800_v50  ;;  %v2013_v50 = vld [vmem:[%s4988_s5] sm:$0xff] }
  0xfc   :  { %v3051_v14 = vpack.c.bf16 %v2014_v43, %v2013_v50 }
  0xfe   :  { %3052 = vmatpush3.bf16.msra.mxu0 %v3051_v14 }
  0xff   :  { %2649 = vmatprep.subr.mxu0 %v3124_v63 }
 0x102   :  { %2650 = vmatpush3.msk.msra.mxu0 %vm2027_vm2, %v2015_v23 }
 0x120   :  { %v2213_v56 = vpop.f32.mrb[0].mxu0 }
 0x121   :  { %v2214_v41 = vpop.f32.mrb[1].mxu0 }
 0x122   :  { %v2248_v10 = vpop.f32.mrb[0].mxu1  ;;  %v2215_v47 = vadd.f32 %v2214_v41, %v2213_v56  ;;  %v2178_v41 = vld [vmem:[%s4989_s6] ss:$0 sm:$0xff] }
 0x123   :  { %v2249_v61 = vpop.f32.mrb[1].mxu1 }
 0x124   :  { %v2250_v0 = vadd.f32 %v2249_v61, %v2248_v10 }
 0x126   :  { %v575_v9 = vadd.f32 %v2250_v0, %v2215_v47  ;;  %v714_v1 = vpop.f32.mrb[2].mxu1 }
 0x127   :  { %v2623_v62 = vpop.f32.mrb[3].mxu1 }
 0x140   :  { %v2283_v33 = vpop.f32.mrb[2].mxu0 }
 0x141   :  { %v2284_v27 = vpop.f32.mrb[3].mxu0 }
 0x142   :  { %v2285_v60 = vadd.f32 %v2284_v27, %v2283_v33 }
 0x144   :  { %v645_v29 = vadd.f32 %v2285_v60, %v575_v9 }
 0x146   :  { %v2321_v5 = vpop.f32.mrb[4].mxu1  ;;  %v715_v45 = vadd.f32 %v714_v1, %v645_v29 }
 0x147   :  { %v2322_v6 = vpop.f32.mrb[5].mxu1 }
 0x148   :  { %v2323_v12 = vadd.f32 %v2322_v6, %v2321_v5 }
 0x14a   :  { %v828_v20 = vadd.f32 %v2323_v12, %v715_v45 }
 0x160   :  { %v2356_v7 = vpop.f32.mrb[4].mxu0 }
 0x161   :  { %v2357_v57 = vpop.f32.mrb[5].mxu0 }
 0x162   :  { %v2358_v46 = vadd.f32 %v2357_v57, %v2356_v7 }
 0x164   :  { %v898_v22 = vadd.f32 %v2358_v46, %v828_v20 }
 0x166   :  { %v2391_v25 = vpop.f32.mrb[6].mxu1 }
 0x167   :  { %v2392_v54 = vpop.f32.mrb[7].mxu1 }
 0x168   :  { %v2393_v44 = vadd.f32 %v2392_v54, %v2391_v25 }
 0x16a   :  { %v968_v13 = vadd.f32 %v2393_v44, %v898_v22  ;;  %v1037_v19 = vpop.f32.mrb[8].mxu1 }
 0x16b   :  { %v2630_v53 = vpop.f32.mrb[9].mxu1 }
 0x16c   :  { %v1038_v30 = vadd.f32 %v1037_v19, %v968_v13 }
 0x180   :  { %v2429_v24 = vpop.f32.mrb[6].mxu0 }
 0x181   :  { %v2430_v40 = vpop.f32.mrb[7].mxu0 }
 0x182   :  { %v2431_v63 = vadd.f32 %v2430_v40, %v2429_v24 }
 0x18a   :  { %v2464_v31 = vpop.f32.mrb[10].mxu1 }
 0x18b   :  { %v2465_v32 = vpop.f32.mrb[11].mxu1 }
 0x18c   :  { %v2466_v3 = vadd.f32 %v2465_v32, %v2464_v31 }
 0x18e   :  { %v1379_v58 = vadd.f32 %v2466_v3, %v2431_v63  ;;  %v1518_v36 = vpop.f32.mrb[12].mxu1 }
 0x18f   :  { %v2637_v35 = vpop.f32.mrb[13].mxu1 }
 0x1a0   :  { %v2499_v17 = vpop.f32.mrb[8].mxu0 }
 0x1a1   :  { %v2500_v48 = vpop.f32.mrb[9].mxu0 }
 0x1a2   :  { %v2501_v52 = vadd.f32 %v2500_v48, %v2499_v17 }
 0x1a4   :  { %v1449_v11 = vadd.f32 %v2501_v52, %v1379_v58 }
 0x1a6   :  { %v1519_v49 = vadd.f32 %v1518_v36, %v1449_v11 }
 0x1a8   :  { %v1522_v21 = vadd.f32 %v1519_v49, %v1038_v30 }
 0x1ae   :  { %v2537_v51 = vpop.f32.mrb[14].mxu1 }
 0x1af   :  { %v2538_v28 = vpop.f32.mrb[15].mxu1 }
 0x1b0   :  { %v2539_v37 = vadd.f32 %v2538_v28, %v2537_v51 }
 0x1c0   :  { %v2572_v55 = vpop.f32.mrb[10].mxu0 }
 0x1c1   :  { %v2573_v8 = vpop.f32.mrb[11].mxu0 }
 0x1c2   :  { %v2574_v34 = vadd.f32 %v2573_v8, %v2572_v55 }
 0x1c4   :  { %v1861_v15 = vadd.f32 %v2574_v34, %v2539_v37  ;;  %v2000_v38 = vpop.f32.mrb[12].mxu0 }
 0x1c5   :  { %v2644_v16 = vpop.f32.mrb[13].mxu0 }
 0x1ce   :  { %v2607_v18 = vpop.f32.mrb[16].mxu1 }
 0x1cf   :  { %v2608_v42 = vpop.f32.mrb[17].mxu1 }
 0x1d0   :  { %v2609_v59 = vadd.f32 %v2608_v42, %v2607_v18 }
 0x1d2   :  { %v1931_v39 = vadd.f32 %v2609_v59, %v1861_v15 }
 0x1d4   :  { %v2001_v26 = vadd.f32 %v2000_v38, %v1931_v39 }
 0x1d6   :  { %v2004_v4 = vadd.f32 %v2001_v26, %v1522_v21 }
 0x1d8   :  { %v2012_v56 = vadd.f32 %v2177_v2, %v2004_v4 }
 0x1da   :  { %2652 = vmatmul.mubr.msk.f32.vlgmr.msra.gmra.mrb[14].mxu0 %vm2023_vm3, %v2012_v56 }
 0x2ad   :  { %v2097_v10 = vpop.f32.mrb[14].mxu0 }
 0x2ae   :  { %v2098_v47 = vadd.f32 %v2178_v41, %v2097_v10  ;;  %v2653_v61 = vpop.f32.mrb[15].mxu0 }
 0x2b0   :  { %2102 = vst.msk [vmem:[#allocation7] sm:$0x3] %vm2101_vm4, %v2098_v47 }
 0x2b1   :  { %3102 = shalt.err (!%p3099_p0)
}
 0x2b2   :  { %s3103_s25 = scalar_lea.hbm %s4990_s7, 32 }
 0x2b3   :  { %p3104_p1 = scmp.ne.s32.totalorder %s4990_s7, %s3103_s25  ;;  %p3107_p2 = scmp.lt.u32.totalorder %s3103_s25, %s4990_s7 }
 0x2b5   :  { %p3109_p3 = pnand %p3107_p2, %p3104_p1 }
 0x2b7   :  { %3112 = shalt.err (!%p3109_p3)
}
 0x2b8   :  { %2112 = dma.vmem_to_hbm [thread:$0]  %s2110_s9, 32, %s4990_s7, [#allocation3]  }
 0x2b9   :  { %3117 = dma.done.wait [#allocation3], 32  }
 0x2ba   :  { %3118 = vsyncadd [#allocation3], 4294967264 }
 0x2bb   :  { %2116 = vsyncpa [#allocation3], 1 }
 0x2bc   :  { %2117 = vsyncpa [#allocation4], 1 }
 0x2bd   :  { %2118 = vsyncpa [#allocation6], 1 }

</bundles_post_ra>
